<compile_context>
chip_gen: v5e
topology: v5e:2x2
jax: 0.10.0
libtpu: 0.0.40
codegen_flags: <defaults>
</compile_context>

<pallas_src>
import functools

import jax
import jax.numpy as jnp
from jax.experimental import pallas as pl
from jax.experimental.pallas import tpu as pltpu


def _supcon_lse_kernel(fq_ref, fkt_ref, lse_ref, m_ref, l_ref, *,
                       n_valid, b_pad, tq, tk, fk_resident):
    """One (TQ, TK) tile of the online self-excluded log-sum-exp.

    Scratch (both (TQ,1) f32, persistent across the k axis):
      m : running row max of raw logits (diagonal included, like the ref)
      l : running sum_{j != i, j valid} exp(raw_ij - m_i), online-rescaled
    Output (written on the last k tile): lse_i = m_i + log(l_i + 1e-12).
    """
    qi = pl.program_id(0)
    ki = pl.program_id(1)

    @pl.when(ki == 0)
    def _init():
        m_ref[...] = jnp.full((tq, 1), -jnp.inf, jnp.float32)
        l_ref[...] = jnp.zeros((tq, 1), jnp.float32)

    if fk_resident:
        # f_k^T stays VMEM-resident (constant index_map); slice the k tile.
        start = pl.multiple_of(ki * tk, tk)
        fk_tile = fkt_ref[:, pl.ds(start, tk)]          # (D, tk)
    else:
        fk_tile = fkt_ref[...]                          # streamed (D, tk) block

    # (f_q / T) @ f_k^T on the MXU with f32 accumulation (1/T folded upstream).
    raw = jnp.dot(fq_ref[...], fk_tile, preferred_element_type=jnp.float32)

    # Row max needs no masking: diagonal logit >= 0 and padded columns are 0,
    # so the final running max equals the reference's max over real columns.
    tile_max = jnp.max(raw, axis=1, keepdims=True)
    m_prev = m_ref[...]
    m_new = jnp.maximum(m_prev, tile_max)
    alpha = jnp.exp(m_prev - m_new)
    m_ref[...] = m_new

    # Masking is only needed on tiles touching the diagonal (self-exclusion)
    # or the padded tail columns; everything else takes the plain-exp path.
    hits_diag = jnp.logical_and(qi * tq < (ki + 1) * tk,
                                ki * tk < (qi + 1) * tq)
    if n_valid < b_pad:   # static: aligned batches compile no padding mask
        needs_mask = jnp.logical_or(hits_diag, (ki + 1) * tk > n_valid)
    else:
        needs_mask = hits_diag

    @pl.when(needs_mask)
    def _masked():
        row = qi * tq + jax.lax.broadcasted_iota(jnp.int32, (tq, 1), 0)
        col = ki * tk + jax.lax.broadcasted_iota(jnp.int32, (1, tk), 1)
        keep = row != col                               # broadcast -> (tq, tk)
        if n_valid < b_pad:
            keep = jnp.logical_and(keep, col < n_valid)
        p = jnp.where(keep, jnp.exp(raw - m_new), 0.0)
        l_ref[...] = alpha * l_ref[...] + jnp.sum(p, axis=1, keepdims=True)

    @pl.when(jnp.logical_not(needs_mask))
    def _plain():
        p = jnp.exp(raw - m_new)
        l_ref[...] = alpha * l_ref[...] + jnp.sum(p, axis=1, keepdims=True)

    @pl.when(ki == pl.num_programs(1) - 1)
    def _finalize():
        lse_ref[...] = m_ref[...] + jnp.log(l_ref[...] + jnp.float32(1e-12))


def _round_up(x, m):
    return ((x + m - 1) // m) * m


def _tile_candidates(b_pad, pref):
    cands = []
    for t in (pref, 1024, 512, 256, 128):
        if t is None:
            continue
        t = int(t)
        if t % 128 == 0 and 0 < t <= b_pad and b_pad % t == 0 and t not in cands:
            cands.append(t)
    return cands or [b_pad]


def _vmem_footprint(tq, tk, D, b_pad, itemsize, resident):
    lane = 128
    d_lane = _round_up(max(D, 1), lane)
    d_sub = _round_up(max(D, 1), 8)
    fk_cols = b_pad if resident else tk
    fq_bytes = 2 * tq * d_lane * itemsize        # double-buffered q block
    fk_bytes = 2 * d_sub * fk_cols * itemsize    # resident or streamed f_k^T
    out_bytes = 2 * tq * lane * 4                # lse output block (lane-padded)
    scratch = 2 * tq * lane * 4                  # m, l accumulators
    temps = 6 * tq * tk * 4                      # raw / exp / select temporaries
    return fq_bytes + fk_bytes + out_bytes + scratch + temps


def _vmem_budget():
    cap = 64 * 1024 * 1024
    try:
        info = pltpu.get_tpu_info()
        cap = int(getattr(info, "vmem_capacity_bytes", cap)) or cap
    except Exception:
        pass
    # Leave headroom: ~48 MiB on v7x (64 MiB physical), ~96 MiB on v5e/v6e.
    return max(16 * 1024 * 1024, (3 * cap) // 4)


def _select_config(b_pad, D, itemsize, budget, block_q, block_k):
    tq_cands = _tile_candidates(b_pad, block_q)
    if b_pad >= 256:
        # Megacore (v7x): keep >= 2 q blocks so both TensorCores get work.
        two = [t for t in tq_cands if b_pad // t >= 2]
        tq_cands = two or tq_cands
    tk_cands = _tile_candidates(b_pad, block_k)
    fk_bytes = 2 * _round_up(max(D, 1), 8) * b_pad * itemsize
    res_opts = (True, False) if fk_bytes <= min(8 << 20, budget // 3) else (False,)
    for resident in res_opts:
        for tq in tq_cands:
            for tk in tk_cands:
                if _vmem_footprint(tq, tk, D, b_pad, itemsize, resident) <= budget:
                    return tq, tk, resident
    return tq_cands[-1], tk_cands[-1], False


def supcon_loss(features, labels, temperature=0.07, base_temperature=0.07,
                block_q=None, block_k=None):
    """features: (B, D) float; labels: (B,) 0/1 indicators. Returns scalar loss."""
    B, D = features.shape
    f32 = features.astype(jnp.float32)
    lab = labels.reshape(-1).astype(jnp.float32)
    inv_t = jnp.float32(1.0 / temperature)

    b_pad = _round_up(max(B, 1), 128)
    itemsize = 4  # kernel operands are f32
    budget = _vmem_budget()
    tq, tk, fk_resident = _select_config(b_pad, D, itemsize, budget, block_q, block_k)
    grid = (b_pad // tq, b_pad // tk)

    feats_pad = jnp.pad(f32, ((0, b_pad - B), (0, 0)))
    # Fold 1/T into the q operand once (B*D mults) instead of B^2 divides.
    fq = feats_pad * inv_t                       # (b_pad, D)
    fkt = feats_pad.T                            # (D, b_pad): lane axis = batch

    kernel = functools.partial(
        _supcon_lse_kernel, n_valid=B, b_pad=b_pad, tq=tq, tk=tk,
        fk_resident=fk_resident)

    if fk_resident:
        # Constant index_map -> DMA'd once, stays resident across the grid.
        fk_spec = pl.BlockSpec((D, b_pad), lambda qi, ki: (0, 0))
    else:
        fk_spec = pl.BlockSpec((D, tk), lambda qi, ki: (0, ki))

    fk_reads = 1 if fk_resident else grid[0]
    cost = pl.CostEstimate(
        flops=2 * b_pad * b_pad * D,
        transcendentals=b_pad * b_pad,
        bytes_accessed=(1 + fk_reads) * b_pad * D * itemsize + 4 * b_pad)

    footprint = _vmem_footprint(tq, tk, D, b_pad, itemsize, fk_resident)
    vmem_limit = int(min(budget, max(32 * 1024 * 1024, (5 * footprint) // 4)))

    lse = pl.pallas_call(
        kernel,
        out_shape=jax.ShapeDtypeStruct((b_pad, 1), jnp.float32),
        grid_spec=pltpu.PrefetchScalarGridSpec(
            num_scalar_prefetch=0,
            grid=grid,
            in_specs=[
                pl.BlockSpec((tq, D), lambda qi, ki: (qi, 0)),   # (f_q / T) rows
                fk_spec,                                         # f_k^T blocks
            ],
            out_specs=pl.BlockSpec((tq, 1), lambda qi, ki: (qi, 0)),
            scratch_shapes=[pltpu.VMEM((tq, 1), jnp.float32),    # running max m
                            pltpu.VMEM((tq, 1), jnp.float32)],   # running sum l
        ),
        compiler_params=pltpu.CompilerParams(
            dimension_semantics=("parallel", "arbitrary"),
            vmem_limit_bytes=vmem_limit,
        ),
        cost_estimate=cost,
    )(fq, fkt)

    # --- mask statistics hoisted out of the B^2 loop (linear in the logits) --
    #   sm_i  = sum_j mask_ij            = lab_i * sum_j lab_j - lab_i^2
    #   sml_i = sum_j mask_ij * logit_ij = (lab_i * f_i.(sum_j lab_j f_j)
    #                                       - lab_i^2 * ||f_i||^2) / T
    # Products with lab_i preserve the exact-zero invariant for anchors with
    # no positives (matches the reference's 0 / (0 + eps) = 0 behaviour).
    s_lab = jnp.sum(lab)
    sum_lab_f = f32.T @ lab                       # (D,)
    dot_i = f32 @ sum_lab_f                       # (B,)
    sq_i = jnp.sum(f32 * f32, axis=1)             # (B,)
    sml = inv_t * (lab * dot_i - (lab * lab) * sq_i)
    sm = lab * s_lab - lab * lab

    lse_rows = lse[:B, 0]
    mean_log_proba = (sml - sm * lse_rows) / (sm + jnp.float32(1e-12))
    loss_scale = jnp.float32(temperature / base_temperature)
    return -loss_scale * jnp.mean(mean_log_proba)


def _supcon_loss_ref(features, labels, temperature=0.07, base_temperature=0.07):
    """Pure-JAX reference mirroring the PyTorch module exactly."""
    B, _ = features.shape
    f = features.astype(jnp.float32)
    lab = labels.reshape(B, 1).astype(jnp.float32)
    eye = jnp.eye(B, dtype=jnp.float32)
    mask = (lab.T * lab) * (1.0 - eye)
    logits = f @ f.T / temperature
    logits = logits - jnp.max(logits, axis=1, keepdims=True)
    exp_logits = jnp.exp(logits) * (1.0 - eye)
    log_proba = logits - jnp.log(jnp.sum(exp_logits, axis=1, keepdims=True) + 1e-12)
    mean_log_proba = jnp.sum(mask * log_proba, axis=1) / (jnp.sum(mask, axis=1) + 1e-12)
    loss = -(temperature / base_temperature) * mean_log_proba
    return jnp.mean(loss)


if __name__ == "__main__":
    key = jax.random.PRNGKey(0)

    def _check(B, D, block_q, block_k, tag):
        kf, kl = jax.random.split(jax.random.fold_in(key, B * 1000 + D))
        f = jax.random.normal(kf, (B, D), dtype=jnp.float32)
        f = f / jnp.linalg.norm(f, axis=1, keepdims=True)   # typical SupCon input
        lab = jax.random.bernoulli(kl, 0.5, (B,)).astype(jnp.float32)
        out = jax.block_until_ready(
            supcon_loss(f, lab, block_q=block_q, block_k=block_k))
        ref = _supcon_loss_ref(f, lab)
        assert jnp.allclose(out, ref, rtol=5e-3, atol=5e-3), (tag, out, ref)

    # 2x2 grid: exercises the online reduction across k tiles + diag/off-diag
    # pl.when specialization.
    _check(256, 64, 128, 128, "tiled")
    # Non-aligned batch: exercises the static padding branch + col-validity mask.
    _check(200, 48, 128, 128, "padded")
    # Tiny batch, single heavily padded tile, auto tile selection.
    _check(8, 32, None, None, "small")

    print("KERNEL_OK")
</pallas_src>

<mosaic_0001>
module attributes {stable_mosaic.version = 11 : i64} {
  func.func @_supcon_lse_kernel(%arg0: i32, %arg1: i32, %arg2: memref<128x64xf32, #tpu.memory_space<vmem>>, %arg3: memref<64x256xf32, #tpu.memory_space<vmem>>, %arg4: memref<128x1xf32, #tpu.memory_space<vmem>>, %arg5: memref<128x1xf32, #tpu.memory_space<vmem>>, %arg6: memref<128x1xf32, #tpu.memory_space<vmem>>) attributes {dimension_semantics = [#tpu.dimension_semantics<parallel>, #tpu.dimension_semantics<arbitrary>], iteration_bounds = array<i64: 2, 2>, scalar_prefetch = 0 : i64, scratch_operands = 2 : i64, tpu.core_type = #tpu.core_type<tc>, window_params = [{transform_indices = @transform_0, window_bounds = array<i64: 128, 64>}, {pipeline_mode = #tpu.pipeline_mode<synchronous>, transform_indices = @transform_1, window_bounds = array<i64: 64, 256>}, {transform_indices = @transform_2, window_bounds = array<i64: 128, 1>}]} {
    %c0_i32 = arith.constant 0 : i32
    %0 = arith.cmpi eq, %arg1, %c0_i32 : i32
    %1 = arith.extui %0 : i1 to i32
    %c0_i32_0 = arith.constant 0 : i32
    %2 = arith.cmpi ne, %1, %c0_i32_0 : i32
    scf.if %2 {
      %cst_17 = arith.constant 0xFF800000 : f32
      %33 = vector.broadcast %cst_17 : f32 to vector<128x1xf32>
      %c0_18 = arith.constant 0 : index
      %c0_19 = arith.constant 0 : index
      %34 = vector.load %arg5[%c0_18, %c0_19] : memref<128x1xf32, #tpu.memory_space<vmem>>, vector<128x1xf32>
      tpu.vector_store %arg5[%c0_18, %c0_19], %33 {strides = array<i32>} : memref<128x1xf32, #tpu.memory_space<vmem>>, vector<128x1xf32>,
      %cst_20 = arith.constant 0.000000e+00 : f32
      %35 = vector.broadcast %cst_20 : f32 to vector<128x1xf32>
      %c0_21 = arith.constant 0 : index
      %c0_22 = arith.constant 0 : index
      %36 = vector.load %arg6[%c0_21, %c0_22] : memref<128x1xf32, #tpu.memory_space<vmem>>, vector<128x1xf32>
      tpu.vector_store %arg6[%c0_21, %c0_22], %35 {strides = array<i32>} : memref<128x1xf32, #tpu.memory_space<vmem>>, vector<128x1xf32>,
    } else {
    }
    %c128_i32 = arith.constant 128 : i32
    %3 = arith.muli %arg1, %c128_i32 : i32
    %4 = tpu.assume_multiple %3, 128 : i32
    %c0 = arith.constant 0 : index
    %5 = arith.index_cast %4 : i32 to index
    %6 = vector.load %arg3[%c0, %5] : memref<64x256xf32, #tpu.memory_space<vmem>>, vector<64x128xf32>
    %c0_1 = arith.constant 0 : index
    %c0_2 = arith.constant 0 : index
    %7 = vector.load %arg2[%c0_1, %c0_2] : memref<128x64xf32, #tpu.memory_space<vmem>>, vector<128x64xf32>
    %cst = arith.constant dense<0.000000e+00> : vector<128x128xf32>
    %8 = tpu.matmul %7, %6, %cst {dimension_numbers = #tpu.dot_dimension_numbers<[1], [0], [0], [1], [0, 0, 1, 1], [], []>} : vector<128x64xf32>, vector<64x128xf32>, vector<128x128xf32> -> vector<128x128xf32>
    %cst_3 = arith.constant dense<0xFF800000> : vector<128xf32>
    %9 = vector.multi_reduction <maximumf>, %8, %cst_3 [1] : vector<128x128xf32> to vector<128xf32>
    %10 = vector.shape_cast %9 : vector<128xf32> to vector<128x1xf32>
    %c0_4 = arith.constant 0 : index
    %c0_5 = arith.constant 0 : index
    %11 = vector.load %arg5[%c0_4, %c0_5] : memref<128x1xf32, #tpu.memory_space<vmem>>, vector<128x1xf32>
    %12 = arith.maximumf %11, %10 : vector<128x1xf32>
    %13 = arith.subf %11, %12 : vector<128x1xf32>
    %14 = math.exp %13 : vector<128x1xf32>
    %c0_6 = arith.constant 0 : index
    %c0_7 = arith.constant 0 : index
    %15 = vector.load %arg5[%c0_6, %c0_7] : memref<128x1xf32, #tpu.memory_space<vmem>>, vector<128x1xf32>
    tpu.vector_store %arg5[%c0_6, %c0_7], %12 {strides = array<i32>} : memref<128x1xf32, #tpu.memory_space<vmem>>, vector<128x1xf32>,
    %c128_i32_8 = arith.constant 128 : i32
    %16 = arith.muli %arg0, %c128_i32_8 : i32
    %c1_i32 = arith.constant 1 : i32
    %17 = arith.addi %arg1, %c1_i32 : i32
    %c128_i32_9 = arith.constant 128 : i32
    %18 = arith.muli %17, %c128_i32_9 : i32
    %19 = arith.cmpi slt, %16, %18 : i32
    %c128_i32_10 = arith.constant 128 : i32
    %20 = arith.muli %arg1, %c128_i32_10 : i32
    %c1_i32_11 = arith.constant 1 : i32
    %21 = arith.addi %arg0, %c1_i32_11 : i32
    %c128_i32_12 = arith.constant 128 : i32
    %22 = arith.muli %21, %c128_i32_12 : i32
    %23 = arith.cmpi slt, %20, %22 : i32
    %24 = arith.andi %19, %23 : i1
    %25 = arith.extui %24 : i1 to i32
    %c0_i32_13 = arith.constant 0 : i32
    %26 = arith.cmpi ne, %25, %c0_i32_13 : i32
    scf.if %26 {
      %c128_i32_17 = arith.constant 128 : i32
      %33 = arith.muli %arg0, %c128_i32_17 : i32
      %34 = tpu.iota {dimensions = array<i32: 0>} : vector<128x1xi32>
      %35 = vector.broadcast %33 : i32 to vector<128x1xi32>
      %36 = arith.addi %35, %34 : vector<128x1xi32>
      %c128_i32_18 = arith.constant 128 : i32
      %37 = arith.muli %arg1, %c128_i32_18 : i32
      %38 = tpu.iota {dimensions = array<i32: 1>} : vector<1x128xi32>
      %39 = vector.broadcast %37 : i32 to vector<1x128xi32>
      %40 = arith.addi %39, %38 : vector<1x128xi32>
      %41 = vector.broadcast %36 : vector<128x1xi32> to vector<128x128xi32>
      %42 = vector.broadcast %40 : vector<1x128xi32> to vector<128x128xi32>
      %43 = arith.cmpi ne, %41, %42 : vector<128x128xi32>
      %44 = vector.broadcast %12 : vector<128x1xf32> to vector<128x128xf32>
      %45 = arith.subf %8, %44 : vector<128x128xf32>
      %46 = math.exp %45 : vector<128x128xf32>
      %cst_19 = arith.constant 0.000000e+00 : f32
      %47 = vector.broadcast %cst_19 : f32 to vector<128x128xf32>
      %48 = arith.select %43, %46, %47 : vector<128x128xi1>, vector<128x128xf32>
      %c0_20 = arith.constant 0 : index
      %c0_21 = arith.constant 0 : index
      %49 = vector.load %arg6[%c0_20, %c0_21] : memref<128x1xf32, #tpu.memory_space<vmem>>, vector<128x1xf32>
      %50 = arith.mulf %14, %49 : vector<128x1xf32>
      %cst_22 = arith.constant dense<0.000000e+00> : vector<128xf32>
      %51 = vector.multi_reduction <add>, %48, %cst_22 [1] : vector<128x128xf32> to vector<128xf32>
      %52 = vector.shape_cast %51 : vector<128xf32> to vector<128x1xf32>
      %53 = arith.addf %50, %52 : vector<128x1xf32>
      %c0_23 = arith.constant 0 : index
      %c0_24 = arith.constant 0 : index
      %54 = vector.load %arg6[%c0_23, %c0_24] : memref<128x1xf32, #tpu.memory_space<vmem>>, vector<128x1xf32>
      tpu.vector_store %arg6[%c0_23, %c0_24], %53 {strides = array<i32>} : memref<128x1xf32, #tpu.memory_space<vmem>>, vector<128x1xf32>,
    } else {
    }
    %true = arith.constant true
    %27 = arith.xori %24, %true : i1
    %28 = arith.extui %27 : i1 to i32
    %c0_i32_14 = arith.constant 0 : i32
    %29 = arith.cmpi ne, %28, %c0_i32_14 : i32
    scf.if %29 {
      %33 = vector.broadcast %12 : vector<128x1xf32> to vector<128x128xf32>
      %34 = arith.subf %8, %33 : vector<128x128xf32>
      %35 = math.exp %34 : vector<128x128xf32>
      %c0_17 = arith.constant 0 : index
      %c0_18 = arith.constant 0 : index
      %36 = vector.load %arg6[%c0_17, %c0_18] : memref<128x1xf32, #tpu.memory_space<vmem>>, vector<128x1xf32>
      %37 = arith.mulf %14, %36 : vector<128x1xf32>
      %cst_19 = arith.constant dense<0.000000e+00> : vector<128xf32>
      %38 = vector.multi_reduction <add>, %35, %cst_19 [1] : vector<128x128xf32> to vector<128xf32>
      %39 = vector.shape_cast %38 : vector<128xf32> to vector<128x1xf32>
      %40 = arith.addf %37, %39 : vector<128x1xf32>
      %c0_20 = arith.constant 0 : index
      %c0_21 = arith.constant 0 : index
      %41 = vector.load %arg6[%c0_20, %c0_21] : memref<128x1xf32, #tpu.memory_space<vmem>>, vector<128x1xf32>
      tpu.vector_store %arg6[%c0_20, %c0_21], %40 {strides = array<i32>} : memref<128x1xf32, #tpu.memory_space<vmem>>, vector<128x1xf32>,
    } else {
    }
    %c1_i32_15 = arith.constant 1 : i32
    %30 = arith.cmpi eq, %arg1, %c1_i32_15 : i32
    %31 = arith.extui %30 : i1 to i32
    %c0_i32_16 = arith.constant 0 : i32
    %32 = arith.cmpi ne, %31, %c0_i32_16 : i32
    scf.if %32 {
      %c0_17 = arith.constant 0 : index
      %c0_18 = arith.constant 0 : index
      %33 = vector.load %arg5[%c0_17, %c0_18] : memref<128x1xf32, #tpu.memory_space<vmem>>, vector<128x1xf32>
      %c0_19 = arith.constant 0 : index
      %c0_20 = arith.constant 0 : index
      %34 = vector.load %arg6[%c0_19, %c0_20] : memref<128x1xf32, #tpu.memory_space<vmem>>, vector<128x1xf32>
      %cst_21 = arith.constant 9.99999996E-13 : f32
      %35 = vector.broadcast %cst_21 : f32 to vector<128x1xf32>
      %36 = arith.addf %34, %35 : vector<128x1xf32>
      %37 = math.log %36 : vector<128x1xf32>
      %38 = arith.addf %33, %37 : vector<128x1xf32>
      %c0_22 = arith.constant 0 : index
      %c0_23 = arith.constant 0 : index
      %39 = vector.load %arg4[%c0_22, %c0_23] : memref<128x1xf32, #tpu.memory_space<vmem>>, vector<128x1xf32>
      tpu.vector_store %arg4[%c0_22, %c0_23], %38 {strides = array<i32>} : memref<128x1xf32, #tpu.memory_space<vmem>>, vector<128x1xf32>,
    } else {
    }
    return
  }
  func.func @transform_0(%arg0: i32, %arg1: i32) -> (i32, i32) {
    %c0_i32 = arith.constant 0 : i32
    %c0_i32_0 = arith.constant 0 : i32
    return %arg0, %c0_i32 : i32, i32
  }
  func.func @transform_1(%arg0: i32, %arg1: i32) -> (i32, i32) {
    %c0_i32 = arith.constant 0 : i32
    %c0_i32_0 = arith.constant 0 : i32
    %c0_i32_1 = arith.constant 0 : i32
    return %c0_i32, %c0_i32_0 : i32, i32
  }
  func.func @transform_2(%arg0: i32, %arg1: i32) -> (i32, i32) {
    %c0_i32 = arith.constant 0 : i32
    %c0_i32_0 = arith.constant 0 : i32
    return %arg0, %c0_i32 : i32, i32
  }
}

</mosaic_0001>

<bundles_post_ra>
// kernel: tpu_custom_call.1
= control target key start
LH: loop header
LB: loop body
LE: loop exit
PB: predicated region body
PF: predicated region fallthrough
CT: control target
= control target key end

     0   :  { %s1485_s9 = smov 0   ;;  %s1487_s10 = smov 0   ;;  %s2033_s0 = inlined_call_operand.vmem [shape: f32[256,64], index: 0, kind: input, shape index: {}]   ;;  %s2034_s1 = inlined_call_operand.vmem [shape: f32[64,256], index: 1, kind: input, shape index: {}]   ;;  %s2035_s2 = inlined_call_operand.vmem [shape: f32[256,1], index: 2, kind: output, shape index: {}]  }
   0x1   :  { %s1489_s11 = smov 0   ;;  %s1491_s12 = smov 0  }
   0x2   :  { %s1493_s13 = smov 0  }
   0x3 LB: > { %s21_s14 = sadd.s32 1, %s1456_s11  ;;  %s24_s15 = sadd.s32 1, %s1460_s12  ;;  %s1464_s13 = sphi %s1493_s13, %s12_s13   ;;  %s1460_s12 = sphi %s1491_s12, %s2062_s12   ;;  %s1456_s11 = sphi %s1489_s11, %s2061_s11   ;;  %s1452_s10 = sphi %s1487_s10, %s2060_s10   ;;  %s1448_s9 = sphi %s1485_s9, %s2059_s9  }
   0x4   : > { %p22_p0 = scmp.ge.s32.totalorder %s21_s14, 2  ;;  %p1190_p1 = scmp.ge.s32.totalorder %s1464_s13, 1 }
   0x5   : > { %p125_p2 = scmp.lt.s32.totalorder %s1464_s13, 5 }
   0x6   : > { %s2064_s14 = smov (%p22_p0, %s21_s14), 0  ;;  %s2066_s15 = smov (!%p22_p0, %s24_s15), %s1460_s12 }
   0x7   : > { %p126_p3 = pnand %p1190_p1, %p125_p2  ;;  %p26_p4 = scmp.ge.s32.totalorder %s2066_s15, 2 }
   0x9   : > { %s2068_s15 = smov (%p26_p4, %s2066_s15), 0  ;;  %129 = sbr.rel (%p126_p3) target bundleno = 1006 (0x3ee), region = 28 }
   0xe   : > { %s1191_s16 = sshll.u32 %s1452_s10, 4  ;;  %p1195_p6 = scmp.ne.s32.totalorder %s1448_s9, 0 }
   0xf   : > { %p148_p5 = scmp.lt.s32.totalorder %s1191_s16, 31 }
  0x10   : > { %162 = sbr.rel (%p1195_p6) target bundleno = 54 (0x36), region = 32 }
  0x11   : > { %s2070_s16 = smov (!%p148_p5, %s1191_s16), 31 }
  0x12   : > { %s1192_s17 = sshll.u32 %s2070_s16, 3 }
  0x13   : > { %s1523_s20 = scalar_lea.vmem %s2033_s0, %s1192_s17  ;;  %s1528_s23 = scalar_lea.vmem %s2035_s2, %s1192_s17 }
  0x15   : > { %vm163_vm0 = vcmask 7168   ;;  %v1466_v0 = vmov -inf   ;;  %v1467_v1 = vmov 0.0  }
  0x16   : > { %164 = vst.msk [vmem:[#allocation2] sm:$0xff] %vm163_vm0, %v1466_v0 }
  0x17   : > { %165 = vst.msk [vmem:[#allocation2 + $0x8] sm:$0xff] %vm163_vm0, %v1466_v0 }
  0x18   : > { %166 = vst.msk [vmem:[#allocation2 + $0x10] sm:$0xff] %vm163_vm0, %v1466_v0 }
  0x19   : > { %167 = vst.msk [vmem:[#allocation2 + $0x18] sm:$0xff] %vm163_vm0, %v1466_v0 }
  0x1a   : > { %168 = vst.msk [vmem:[#allocation2 + $0x20] sm:$0xff] %vm163_vm0, %v1466_v0 }
  0x1b   : > { %169 = vst.msk [vmem:[#allocation2 + $0x28] sm:$0xff] %vm163_vm0, %v1466_v0 }
  0x1c   : > { %170 = vst.msk [vmem:[#allocation2 + $0x30] sm:$0xff] %vm163_vm0, %v1466_v0 }
  0x1d   : > { %171 = vst.msk [vmem:[#allocation2 + $0x38] sm:$0xff] %vm163_vm0, %v1466_v0 }
  0x1e   : > { %172 = vst.msk [vmem:[#allocation2 + $0x40] sm:$0xff] %vm163_vm0, %v1466_v0 }
  0x1f   : > { %173 = vst.msk [vmem:[#allocation2 + $0x48] sm:$0xff] %vm163_vm0, %v1466_v0 }
  0x20   : > { %174 = vst.msk [vmem:[#allocation2 + $0x50] sm:$0xff] %vm163_vm0, %v1466_v0 }
  0x21   : > { %175 = vst.msk [vmem:[#allocation2 + $0x58] sm:$0xff] %vm163_vm0, %v1466_v0 }
  0x22   : > { %176 = vst.msk [vmem:[#allocation2 + $0x60] sm:$0xff] %vm163_vm0, %v1466_v0 }
  0x23   : > { %177 = vst.msk [vmem:[#allocation2 + $0x68] sm:$0xff] %vm163_vm0, %v1466_v0 }
  0x24   : > { %178 = vst.msk [vmem:[#allocation2 + $0x70] sm:$0xff] %vm163_vm0, %v1466_v0 }
  0x25   : > { %179 = vst.msk [vmem:[#allocation2 + $0x78] sm:$0xff] %vm163_vm0, %v1466_v0 }
  0x26   : > { %180 = vst.msk [vmem:[#allocation3] sm:$0xff] %vm163_vm0, %v1467_v1 }
  0x27   : > { %181 = vst.msk [vmem:[#allocation3 + $0x8] sm:$0xff] %vm163_vm0, %v1467_v1 }
  0x28   : > { %182 = vst.msk [vmem:[#allocation3 + $0x10] sm:$0xff] %vm163_vm0, %v1467_v1 }
  0x29   : > { %183 = vst.msk [vmem:[#allocation3 + $0x18] sm:$0xff] %vm163_vm0, %v1467_v1 }
  0x2a   : > { %184 = vst.msk [vmem:[#allocation3 + $0x20] sm:$0xff] %vm163_vm0, %v1467_v1 }
  0x2b   : > { %185 = vst.msk [vmem:[#allocation3 + $0x28] sm:$0xff] %vm163_vm0, %v1467_v1 }
  0x2c   : > { %186 = vst.msk [vmem:[#allocation3 + $0x30] sm:$0xff] %vm163_vm0, %v1467_v1 }
  0x2d   : > { %187 = vst.msk [vmem:[#allocation3 + $0x38] sm:$0xff] %vm163_vm0, %v1467_v1 }
  0x2e   : > { %188 = vst.msk [vmem:[#allocation3 + $0x40] sm:$0xff] %vm163_vm0, %v1467_v1 }
  0x2f   : > { %189 = vst.msk [vmem:[#allocation3 + $0x48] sm:$0xff] %vm163_vm0, %v1467_v1 }
  0x30   : > { %190 = vst.msk [vmem:[#allocation3 + $0x50] sm:$0xff] %vm163_vm0, %v1467_v1 }
  0x31   : > { %191 = vst.msk [vmem:[#allocation3 + $0x58] sm:$0xff] %vm163_vm0, %v1467_v1 }
  0x32   : > { %192 = vst.msk [vmem:[#allocation3 + $0x60] sm:$0xff] %vm163_vm0, %v1467_v1 }
  0x33   : > { %193 = vst.msk [vmem:[#allocation3 + $0x68] sm:$0xff] %vm163_vm0, %v1467_v1 }
  0x34   : > { %194 = vst.msk [vmem:[#allocation3 + $0x70] sm:$0xff] %vm163_vm0, %v1467_v1 }
  0x35   : > { %195 = vst.msk [vmem:[#allocation3 + $0x78] sm:$0xff] %vm163_vm0, %v1467_v1 }
  0x36 PF: > { %s1564_s24 = sshll.u32 %s1448_s9, 7  ;;  %s1567_s25 = sshll.u32 %s1452_s10, 7  ;;  %v209_v10 = vld [vmem:[%s1523_s20] sm:$0xff]  ;;  %vm225_vm1 = vcmask 523264   ;;  %v210_v14 = vld [vmem:[%s1523_s20 + $0x8] sm:$0xff]  ;;  %v211_v18 = vld [vmem:[%s1523_s20 + $0x10] sm:$0xff] }
  0x37   : > { %s197_s26 = sshra.s32 %s1564_s24, 7  ;;  %s1221_s27 = sadd.s32 128, %s1564_s24  ;;  %v213_v11 = vld [vmem:[%s1523_s20 + $0x20] sm:$0xff]  ;;  %v214_v15 = vld [vmem:[%s1523_s20 + $0x28] sm:$0xff]  ;;  %v215_v19 = vld [vmem:[%s1523_s20 + $0x30] sm:$0xff]  ;;  %vm451_vm2 = vcmask 7168  }
  0x38   : > { %s1197_s28 = sshll.u32 %s197_s26, 3  ;;  %p1572_p7 = scmp.lt.s32.totalorder %s1567_s25, %s1221_s27  ;;  %v217_v12 = vld [vmem:[%s1523_s20 + $0x40] sm:$0xff]  ;;  %v218_v16 = vld [vmem:[%s1523_s20 + $0x48] sm:$0xff]  ;;  %v219_v20 = vld [vmem:[%s1523_s20 + $0x50] sm:$0xff] }
  0x39   : > { %s1579_s4 = scalar_lea.vmem %s2034_s1, %s1197_s28  ;;  %s1223_s5 = sadd.s32 128, %s1567_s25  ;;  %v221_v13 = vld [vmem:[%s1523_s20 + $0x60] sm:$0xff]  ;;  %v222_v17 = vld [vmem:[%s1523_s20 + $0x68] sm:$0xff]  ;;  %v223_v21 = vld [vmem:[%s1523_s20 + $0x70] sm:$0xff] }
  0x3a   : > { %v208_v2 = vld [vmem:[%s1579_s4 + $0x70] sm:$0xff]  ;;  %p1584_p8 = scmp.lt.s32.totalorder %s1564_s24, %s1223_s5  ;;  %v207_v3 = vld [vmem:[%s1579_s4 + $0x60] sm:$0xff]  ;;  %v212_v22 = vld [vmem:[%s1523_s20 + $0x18] sm:$0xff] }
  0x3b   : > { %282 = vmatpush.msra.mxu0 %v208_v2  ;;  %1224 = vmatpush.msra.mxu1 %v208_v2  ;;  %v206_v4 = vld [vmem:[%s1579_s4 + $0x50] sm:$0xff]  ;;  %v205_v5 = vld [vmem:[%s1579_s4 + $0x40] sm:$0xff]  ;;  %v216_v23 = vld [vmem:[%s1523_s20 + $0x38] sm:$0xff] }
  0x3c   : > { %p475_p9 = pnand %p1584_p8, %p1572_p7  ;;  %1225 = vmatpush.msra.mxu2 %v208_v2  ;;  %1226 = vmatpush.msra.mxu3 %v208_v2  ;;  %v204_v6 = vld [vmem:[%s1579_s4 + $0x30] sm:$0xff]  ;;  %v203_v7 = vld [vmem:[%s1579_s4 + $0x20] sm:$0xff]  ;;  %v220_v24 = vld [vmem:[%s1523_s20 + $0x58] sm:$0xff] }
  0x3d   : > { %283 = vmatpush.msra.mxu0 %v207_v3  ;;  %1227 = vmatpush.msra.mxu1 %v207_v3  ;;  %v202_v8 = vld [vmem:[%s1579_s4 + $0x10] sm:$0xff]  ;;  %v201_v9 = vld [vmem:[%s1579_s4] sm:$0xff]  ;;  %v224_v25 = vld [vmem:[%s1523_s20 + $0x78] sm:$0xff] }
  0x3e   : > { %1228 = vmatpush.msra.mxu2 %v207_v3  ;;  %1229 = vmatpush.msra.mxu3 %v207_v3  ;;  %v375_v42 = vld [vmem:[#allocation2 + $0x20] sm:$0xff]  ;;  %v373_v0 = vld [vmem:[#allocation2 + $0x10] sm:$0xff]  ;;  %v376_v1 = vld [vmem:[#allocation2 + $0x28] sm:$0xff] }
  0x3f   : > { %284 = vmatpush.msra.mxu0 %v206_v4  ;;  %1230 = vmatpush.msra.mxu1 %v206_v4  ;;  %v371_v43 = vld [vmem:[#allocation2] sm:$0xff]  ;;  %v372_v2 = vld [vmem:[#allocation2 + $0x8] sm:$0xff] }
  0x40   : > { %1231 = vmatpush.msra.mxu2 %v206_v4  ;;  %1232 = vmatpush.msra.mxu3 %v206_v4  ;;  %v379_v52 = vld [vmem:[#allocation2 + $0x40] sm:$0xff] }
  0x41   : > { %285 = vmatpush.msra.mxu0 %v205_v5  ;;  %1233 = vmatpush.msra.mxu1 %v205_v5  ;;  %v383_v53 = vld [vmem:[#allocation2 + $0x60] sm:$0xff] }
  0x42   : > { %1234 = vmatpush.msra.mxu2 %v205_v5  ;;  %1235 = vmatpush.msra.mxu3 %v205_v5 }
  0x43   : > { %286 = vmatpush.msra.mxu0 %v204_v6  ;;  %1236 = vmatpush.msra.mxu1 %v204_v6 }
  0x44   : > { %1237 = vmatpush.msra.mxu2 %v204_v6  ;;  %1238 = vmatpush.msra.mxu3 %v204_v6 }
  0x45   : > { %287 = vmatpush.msra.mxu0 %v203_v7  ;;  %1239 = vmatpush.msra.mxu1 %v203_v7 }
  0x46   : > { %1240 = vmatpush.msra.mxu2 %v203_v7  ;;  %1241 = vmatpush.msra.mxu3 %v203_v7 }
  0x47   : > { %288 = vmatpush.msra.mxu0 %v202_v8  ;;  %1242 = vmatpush.msra.mxu1 %v202_v8 }
  0x48   : > { %1243 = vmatpush.msra.mxu2 %v202_v8  ;;  %1244 = vmatpush.msra.mxu3 %v202_v8 }
  0x49   : > { %289 = vmatpush.msra.mxu0 %v201_v9  ;;  %1245 = vmatpush.msra.mxu1 %v201_v9 }
  0x4a   : > { %1198 = vmatmul.msk.f32.vlgmr.msra.gmra.mxu0 %vm225_vm1, %v209_v10  ;;  %1202 = vmatmul.msk.f32.vlgmr.msra.gmra.mxu1 %vm225_vm1, %v213_v11 }
  0x4b   : > { %1246 = vmatpush.msra.mxu2 %v201_v9  ;;  %1247 = vmatpush.msra.mxu3 %v201_v9 }
  0x4c   : > { %1206 = vmatmul.msk.f32.vlgmr.msra.gmra.mxu2 %vm225_vm1, %v217_v12  ;;  %1210 = vmatmul.msk.f32.vlgmr.msra.gmra.mxu3 %vm225_vm1, %v221_v13 }
  0x52   : > { %1199 = vmatmul.msk.f32.gmra.mxu0 %vm225_vm1, %v210_v14  ;;  %1203 = vmatmul.msk.f32.gmra.mxu1 %vm225_vm1, %v214_v15 }
  0x54   : > { %1207 = vmatmul.msk.f32.gmra.mxu2 %vm225_vm1, %v218_v16  ;;  %1211 = vmatmul.msk.f32.gmra.mxu3 %vm225_vm1, %v222_v17  ;;  %v381_v17 = vld [vmem:[#allocation2 + $0x50] sm:$0xff] }
  0x5a   : > { %1200 = vmatmul.msk.f32.gmra.mxu0 %vm225_vm1, %v211_v18  ;;  %1204 = vmatmul.msk.f32.gmra.mxu1 %vm225_vm1, %v215_v19  ;;  %v380_v18 = vld [vmem:[#allocation2 + $0x48] sm:$0xff] }
  0x5c   : > { %1208 = vmatmul.msk.f32.gmra.mxu2 %vm225_vm1, %v219_v20  ;;  %1212 = vmatmul.msk.f32.gmra.mxu3 %vm225_vm1, %v223_v21 }
  0x62   : > { %1201 = vmatmul.msk.f32.gmra.mxu0 %vm225_vm1, %v212_v22  ;;  %1205 = vmatmul.msk.f32.gmra.mxu1 %vm225_vm1, %v216_v23 }
  0x64   : > { %1209 = vmatmul.msk.f32.gmra.mxu2 %vm225_vm1, %v220_v24  ;;  %1213 = vmatmul.msk.f32.gmra.mxu3 %vm225_vm1, %v224_v25 }
  0xc7   : > { %v1631_v26 = vpop.f32.mrf.mxu0  ;;  %v1633_v27 = vpop.f32.mrf.mxu1 }
  0xc8   : > { %2045 = vst [vmem:[#allocation4_spill] sm:$0xff] %v1631_v26  ;;  %347 = vmax.xlane.f32.xlu2 %v1633_v27  ;;  %339 = vmax.xlane.f32.xlu0 %v1631_v26 }
  0xc9   : > { %2046 = vst [vmem:[#allocation5_spill] sm:$0xff] %v1633_v27 }
  0xcf   : > { %v1637_v28 = vpop.f32.mrf.mxu0  ;;  %v1639_v29 = vpop.f32.mrf.mxu2 }
  0xd0   : > { %2047 = vst [vmem:[#allocation6_spill] sm:$0xff] %v1637_v28  ;;  %v1641_v30 = vpop.f32.mrf.mxu3  ;;  %355 = vmax.xlane.f32.xlu2 %v1639_v29  ;;  %v1645_v31 = vpop.f32.mrf.mxu1 }
  0xd1   : > { %363 = vmax.xlane.f32.xlu0 %v1641_v30 }
  0xd7   : > { %v1647_v32 = vpop.f32.mrf.mxu0  ;;  %v1649_v33 = vpop.f32.mrf.mxu2 }
  0xd8   : > { %2048 = vst [vmem:[#allocation7_spill] sm:$0xff] %v1647_v32  ;;  %343 = vmax.xlane.f32.xlu1 %v1647_v32  ;;  %349 = vmax.xlane.f32.xlu2 %v1645_v31  ;;  %v1654_v34 = vpop.f32.mrf.mxu3  ;;  %v1660_v36 = vpop.f32.mrf.mxu1 }
  0xd9   : > { %2049 = vst [vmem:[#allocation8_spill] sm:$0xff] %v1649_v33  ;;  %341 = vmax.xlane.f32.xlu0 %v1637_v28 }
  0xda   : > { %2050 = vst [vmem:[#allocation9_spill] sm:$0xff] %v1660_v36 }
  0xdf   : > { %v1656_v35 = vpop.f32.mrf.mxu2  ;;  %v1664_v38 = vpop.f32.mrf.mxu0 }
  0xe0   : > { %359 = vmax.xlane.f32.xlu1 %v1656_v35  ;;  %v1662_v37 = vpop.f32.mrf.mxu3  ;;  %v1671_v40 = vpop.f32.mrf.mxu1 }
  0xe1   : > { %357 = vmax.xlane.f32.xlu0 %v1649_v33 }
  0xe7   : > { %v1666_v39 = vpop.f32.mrf.mxu2 }
  0xe8   : > { %361 = vmax.xlane.f32.xlu2 %v1666_v39  ;;  %345 = vmax.xlane.f32.xlu1 %v1664_v38  ;;  %v1673_v41 = vpop.f32.mrf.mxu3 }
  0xe9   : > { %351 = vmax.xlane.f32.xlu0 %v1660_v36 }
  0xf0   : > { %367 = vmax.xlane.f32.xlu2 %v1662_v37  ;;  %353 = vmax.xlane.f32.xlu1 %v1671_v40 }
  0xf1   : > { %369 = vmax.xlane.f32.xlu0 %v1673_v41 }
  0xf8   : > { %365 = vmax.xlane.f32.xlu1 %v1654_v34 }
 0x13b   : > { %v348_v44 = vpop.xlane.xlu2 %347  ;;  %v340_v45 = vpop.xlane.xlu0 %339 }
 0x13c   : > { %v1679_v46 = vmax.f32 %v375_v42, %v348_v44  ;;  %v1681_v47 = vmax.f32 %v371_v43, %v340_v45  ;;  %v382_v45 = vld [vmem:[#allocation2 + $0x58] sm:$0xff] }
 0x13e   : > { %v407_v48 = vsub.f32 %v375_v42, %v1679_v46  ;;  %456 = vst.msk [vmem:[#allocation2 + $0x20] sm:$0xff] %vm451_vm2, %v1679_v46  ;;  %v403_v49 = vsub.f32 %v371_v43, %v1681_v47 }
 0x13f   : > { %452 = vst.msk [vmem:[#allocation2] sm:$0xff] %vm451_vm2, %v1681_v47 }
 0x140   : > { %v427_v50 = vmul.f32 1.442695, %v407_v48  ;;  %v419_v51 = vmul.f32 1.442695, %v403_v49  ;;  %v374_v48 = vld [vmem:[#allocation2 + $0x18] sm:$0xff] }
 0x142   : > { %1292 = vpow2.f32 %v427_v50  ;;  %v377_v50 = vld [vmem:[#allocation2 + $0x30] sm:$0xff] }
 0x143   : > { %1294 = vpow2.f32 %v419_v51  ;;  %v356_v54 = vpop.xlane.xlu2 %355 }
 0x144   : > { %v1689_v55 = vmax.f32 %v379_v52, %v356_v54  ;;  %v364_v56 = vpop.xlane.xlu0 %363 }
 0x145   : > { %v1691_v57 = vmax.f32 %v383_v53, %v364_v56 }
 0x146   : > { %v411_v58 = vsub.f32 %v379_v52, %v1689_v55  ;;  %460 = vst.msk [vmem:[#allocation2 + $0x40] sm:$0xff] %vm451_vm2, %v1689_v55 }
 0x147   : > { %v415_v59 = vsub.f32 %v383_v53, %v1691_v57  ;;  %464 = vst.msk [vmem:[#allocation2 + $0x60] sm:$0xff] %vm451_vm2, %v1691_v57 }
 0x148   : > { %v1699_v60 = vpop.eup %1292  ;;  %v435_v61 = vmul.f32 1.442695, %v411_v58 }
 0x149   : > { %v1701_v62 = vpop.eup %1294  ;;  %v443_v63 = vmul.f32 1.442695, %v415_v59 }
 0x14a   : > { %1296 = vpow2.f32 %v435_v61 }
 0x14b   : > { %1298 = vpow2.f32 %v443_v63  ;;  %v344_v3 = vpop.xlane.xlu1 %343  ;;  %v350_v4 = vpop.xlane.xlu2 %349 }
 0x14c   : > { %v342_v5 = vpop.xlane.xlu0 %341  ;;  %v1703_v6 = vmax.f32 %v373_v0, %v344_v3  ;;  %v1705_v7 = vmax.f32 %v376_v1, %v350_v4 }
 0x14d   : > { %v1707_v8 = vmax.f32 %v372_v2, %v342_v5  ;;  %v385_v5 = vld [vmem:[#allocation2 + $0x70] sm:$0xff] }
 0x14e   : > { %v405_v9 = vsub.f32 %v373_v0, %v1703_v6  ;;  %454 = vst.msk [vmem:[#allocation2 + $0x10] sm:$0xff] %vm451_vm2, %v1703_v6  ;;  %v408_v10 = vsub.f32 %v376_v1, %v1705_v7 }
 0x14f   : > { %v404_v11 = vsub.f32 %v372_v2, %v1707_v8  ;;  %453 = vst.msk [vmem:[#allocation2 + $0x8] sm:$0xff] %vm451_vm2, %v1707_v8 }
 0x150   : > { %v1716_v12 = vpop.eup %1296  ;;  %v423_v13 = vmul.f32 1.442695, %v405_v9  ;;  %v429_v14 = vmul.f32 1.442695, %v408_v10  ;;  %457 = vst.msk [vmem:[#allocation2 + $0x28] sm:$0xff] %vm451_vm2, %v1705_v7  ;;  %v378_v9 = vld [vmem:[#allocation2 + $0x38] sm:$0xff] }
 0x151   : > { %v1720_v15 = vpop.eup %1298  ;;  %v421_v16 = vmul.f32 1.442695, %v404_v11  ;;  %v386_v10 = vld [vmem:[#allocation2 + $0x78] sm:$0xff] }
 0x152   : > { %1300 = vpow2.f32 %v423_v13 }
 0x153   : > { %1302 = vpow2.f32 %v421_v16  ;;  %v360_v19 = vpop.xlane.xlu1 %359 }
 0x154   : > { %1304 = vpow2.f32 %v429_v14  ;;  %v358_v20 = vpop.xlane.xlu0 %357  ;;  %v1722_v21 = vmax.f32 %v381_v17, %v360_v19 }
 0x155   : > { %v1724_v22 = vmax.f32 %v380_v18, %v358_v20 }
 0x156   : > { %v413_v23 = vsub.f32 %v381_v17, %v1722_v21  ;;  %462 = vst.msk [vmem:[#allocation2 + $0x50] sm:$0xff] %vm451_vm2, %v1722_v21 }
 0x157   : > { %v412_v24 = vsub.f32 %v380_v18, %v1724_v22  ;;  %461 = vst.msk [vmem:[#allocation2 + $0x48] sm:$0xff] %vm451_vm2, %v1724_v22 }
 0x158   : > { %v1732_v25 = vpop.eup %1300  ;;  %v439_v42 = vmul.f32 1.442695, %v413_v23 }
 0x159   : > { %v1734_v43 = vpop.eup %1302  ;;  %v437_v44 = vmul.f32 1.442695, %v412_v24 }
 0x15a   : > { %v1736_v49 = vpop.eup %1304  ;;  %1306 = vpow2.f32 %v439_v42 }
 0x15b   : > { %1308 = vpow2.f32 %v437_v44  ;;  %v362_v51 = vpop.xlane.xlu2 %361  ;;  %v346_v52 = vpop.xlane.xlu1 %345 }
 0x15c   : > { %v1738_v53 = vmax.f32 %v382_v45, %v362_v51  ;;  %v352_v54 = vpop.xlane.xlu0 %351  ;;  %v1740_v56 = vmax.f32 %v374_v48, %v346_v52 }
 0x15d   : > { %v1742_v58 = vmax.f32 %v377_v50, %v352_v54 }
 0x15e   : > { %v414_v59 = vsub.f32 %v382_v45, %v1738_v53  ;;  %463 = vst.msk [vmem:[#allocation2 + $0x58] sm:$0xff] %vm451_vm2, %v1738_v53  ;;  %v406_v61 = vsub.f32 %v374_v48, %v1740_v56 }
 0x15f   : > { %v409_v63 = vsub.f32 %v377_v50, %v1742_v58  ;;  %458 = vst.msk [vmem:[#allocation2 + $0x30] sm:$0xff] %vm451_vm2, %v1742_v58  ;;  %v384_v50 = vld [vmem:[#allocation2 + $0x68] sm:$0xff] }
 0x160   : > { %v1751_v0 = vpop.eup %1306  ;;  %v441_v1 = vmul.f32 1.442695, %v414_v59  ;;  %v425_v2 = vmul.f32 1.442695, %v406_v61  ;;  %455 = vst.msk [vmem:[#allocation2 + $0x18] sm:$0xff] %vm451_vm2, %v1740_v56 }
 0x161   : > { %v1755_v3 = vpop.eup %1308  ;;  %v431_v4 = vmul.f32 1.442695, %v409_v63 }
 0x162   : > { %1310 = vpow2.f32 %v441_v1 }
 0x163   : > { %1312 = vpow2.f32 %v431_v4  ;;  %v368_v11 = vpop.xlane.xlu2 %367  ;;  %v354_v13 = vpop.xlane.xlu1 %353 }
 0x164   : > { %1314 = vpow2.f32 %v425_v2  ;;  %v1757_v14 = vmax.f32 %v385_v5, %v368_v11  ;;  %v1759_v16 = vmax.f32 %v378_v9, %v354_v13  ;;  %v370_v17 = vpop.xlane.xlu0 %369 }
 0x165   : > { %v1761_v18 = vmax.f32 %v386_v10, %v370_v17 }
 0x166   : > { %v417_v19 = vsub.f32 %v385_v5, %v1757_v14  ;;  %466 = vst.msk [vmem:[#allocation2 + $0x70] sm:$0xff] %vm451_vm2, %v1757_v14  ;;  %v410_v20 = vsub.f32 %v378_v9, %v1759_v16 }
 0x167   : > { %2051 = vst [vmem:[#allocation10_spill] sm:$0xff] %v1761_v18  ;;  %v418_v23 = vsub.f32 %v386_v10, %v1761_v18 }
 0x168   : > { %459 = vst.msk [vmem:[#allocation2 + $0x38] sm:$0xff] %vm451_vm2, %v1759_v16  ;;  %v1770_v24 = vpop.eup %1310  ;;  %v447_v42 = vmul.f32 1.442695, %v417_v19  ;;  %v433_v44 = vmul.f32 1.442695, %v410_v20 }
 0x169   : > { %467 = vst.msk [vmem:[#allocation2 + $0x78] sm:$0xff] %vm451_vm2, %v1761_v18  ;;  %v1774_v45 = vpop.eup %1312  ;;  %v449_v48 = vmul.f32 1.442695, %v418_v23 }
 0x16a   : > { %v1776_v51 = vpop.eup %1314  ;;  %1316 = vpow2.f32 %v447_v42 }
 0x16b   : > { %1318 = vpow2.f32 %v433_v44  ;;  %v366_v52 = vpop.xlane.xlu1 %365 }
 0x16c   : > { %1320 = vpow2.f32 %v449_v48  ;;  %v1778_v54 = vmax.f32 %v384_v50, %v366_v52 }
 0x16e   : > { %v416_v59 = vsub.f32 %v384_v50, %v1778_v54  ;;  %465 = vst.msk [vmem:[#allocation2 + $0x68] sm:$0xff] %vm451_vm2, %v1778_v54 }
 0x170   : > { %v1783_v61 = vpop.eup %1316  ;;  %v445_v63 = vmul.f32 1.442695, %v416_v59 }
 0x171   : > { %v1785_v1 = vpop.eup %1318 }
 0x172   : > { %v1787_v2 = vpop.eup %1320  ;;  %1322 = vpow2.f32 %v445_v63 }
 0x174   : > { %478 = sbr.rel (%p475_p9) target bundleno = 673 (0x2a1), region = 36 }
 0x178   : > { %v1789_v4 = vpop.eup %1322 }
 0x179   : > { %v1468_v5 = vmov 0   ;;  %v479_v9 = vlaneseq  ;;  %v1819_v52 = vstv %s1567_s25  ;;  %v515_v59 = vstv %s1564_s24 }
 0x17a   : > { %1325 = vset.pattern.permute.xlu1 %v1468_v5  ;;  %1324 = vset.pattern.permute.xlu0 %v1468_v5 }
 0x17b   : > { %545 = vperm.xlu1 %1325, %v1703_v6   ;;  %535 = vperm.xlu0 %1324, %v1681_v47   ;;  %v1812_v10 = vshrl.u32 %v479_v9, 7  ;;  %v514_v44 = vand.u32 127, %v479_v9 }
 0x17c   : > { %1326 = vset.pattern.permute.xlu2 %v1468_v5 }
 0x17d   : > { %555 = vperm.xlu2 %1326, %v1679_v46   ;;  %v482_v23 = vadd.s32 16, %v1812_v10 }
 0x17f   : > { %v499_v63 = vadd.s32 %v1819_v52, %v482_v23 }
 0x183   : > { %550 = vperm.xlu1 %1325, %v1740_v56   ;;  %540 = vperm.xlu0 %1324, %v1707_v8  }
 0x185   : > { %560 = vperm.xlu2 %1326, %v1705_v7  }
 0x18b   : > { %570 = vperm.xlu1 %1325, %v1759_v16   ;;  %565 = vperm.xlu0 %1324, %v1742_v58  }
 0x18d   : > { %575 = vperm.xlu2 %1326, %v1689_v55  }
 0x193   : > { %585 = vperm.xlu1 %1325, %v1722_v21   ;;  %580 = vperm.xlu0 %1324, %v1724_v22  }
 0x195   : > { %590 = vperm.xlu2 %1326, %v1738_v53  }
 0x19b   : > { %600 = vperm.xlu1 %1325, %v1778_v54   ;;  %595 = vperm.xlu0 %1324, %v1691_v57  }
 0x19d   : > { %605 = vperm.xlu2 %1326, %v1757_v14  }
 0x1a3   : > { %610 = vperm.xlu0 %1324, %v1761_v18  }
 0x1d7   : > { %v556_v17 = vpop.permute.xlu2 %555 }
 0x1d8   : > { %v617_v42 = vsub.f32 %v1633_v27, %v556_v17  ;;  %v484_v17 = vadd.s32 32, %v1812_v10 }
 0x1da   : > { %v637_v5 = vmul.f32 1.442695, %v617_v42 }
 0x1df   : > { %v561_v23 = vpop.permute.xlu2 %560 }
 0x1ed   : > { %v546_v11 = vpop.permute.xlu1 %545  ;;  %v536_v13 = vpop.permute.xlu0 %535 }
 0x1ee   : > { %v615_v19 = vsub.f32 %v1647_v32, %v546_v11  ;;  %v613_v20 = vsub.f32 %v1631_v26, %v536_v13  ;;  %v497_v11 = vadd.s32 %v1819_v52, %v1812_v10  ;;  %v1825_v32 = vadd.s32 %v515_v59, %v514_v44 }
 0x1f0   : > { %v633_v48 = vmul.f32 1.442695, %v615_v19  ;;  %v629_v50 = vmul.f32 1.442695, %v613_v20  ;;  %vm519_vm3 = vcmp.ne.s32.totalorder %v499_v63, %v1825_v32  ;;  %vm517_vm4 = vcmp.ne.s32.totalorder %v497_v11, %v1825_v32 }
 0x1f1   : > { %v481_v19 = vadd.s32 8, %v1812_v10 }
 0x1f2   : > { %1327 = vpow2.f32 %v633_v48 }
 0x1f3   : > { %1329 = vpow2.f32 %v629_v50  ;;  %v501_v50 = vadd.s32 %v1819_v52, %v484_v17  ;;  %v486_v17 = vadd.s32 48, %v1812_v10 }
 0x1f4   : > { %1331 = vpow2.f32 %v637_v5 }
 0x1f5   : > { %v551_v13 = vpop.permute.xlu1 %550  ;;  %v541_v26 = vpop.permute.xlu0 %540  ;;  %vm521_vm5 = vcmp.ne.s32.totalorder %v501_v50, %v1825_v32 }
 0x1f6   : > { %v614_v9 = vsub.f32 %v1637_v28, %v541_v26  ;;  %v616_v44 = vsub.f32 %v1664_v38, %v551_v13  ;;  %v498_v26 = vadd.s32 %v1819_v52, %v481_v19  ;;  %v487_v13 = vadd.s32 56, %v1812_v10  ;;  %v576_v50 = vpop.permute.xlu2 %575 }
 0x1f7   : > { %v483_v19 = vadd.s32 24, %v1812_v10 }
 0x1f8   : > { %v1328_v20 = vpop.eup %1327  ;;  %v631_v42 = vmul.f32 1.442695, %v614_v9  ;;  %v635_v5 = vmul.f32 1.442695, %v616_v44  ;;  %vm518_vm6 = vcmp.ne.s32.totalorder %v498_v26, %v1825_v32  ;;  %v618_v44 = vsub.f32 %v1645_v31, %v561_v23 }
 0x1f9   : > { %v1330_v48 = vpop.eup %1329  ;;  %v663_v59 = vsel %vm519_vm3, %v1328_v20, 0.0  ;;  %v503_v26 = vadd.s32 %v1819_v52, %v486_v17 }
 0x1fa   : > { %v661_v27 = vsel %vm517_vm4, %v1330_v48, 0.0  ;;  %713 = vadd.xlane.f32.xlu0 %v663_v59  ;;  %1333 = vpow2.f32 %v631_v42  ;;  %v1332_v63 = vpop.eup %1331 }
 0x1fb   : > { %709 = vadd.xlane.f32.xlu1 %v661_v27  ;;  %v665_v42 = vsel %vm521_vm5, %v1332_v63, 0.0  ;;  %1335 = vpow2.f32 %v635_v5  ;;  %v490_v5 = vadd.s32 80, %v1812_v10  ;;  %vm523_vm8 = vcmp.ne.s32.totalorder %v503_v26, %v1825_v32 }
 0x1fd   : > { %v571_v11 = vpop.permute.xlu1 %570  ;;  %v566_v28 = vpop.permute.xlu0 %565 }
 0x1fe   : > { %v620_v9 = vsub.f32 %v1671_v40, %v571_v11  ;;  %v619_v18 = vsub.f32 %v1660_v36, %v566_v28  ;;  %v504_v28 = vadd.s32 %v1819_v52, %v487_v13  ;;  %v500_v11 = vadd.s32 %v1819_v52, %v483_v19 }
 0x1ff   : > { %v489_v13 = vadd.s32 72, %v1812_v10  ;;  %v485_v19 = vadd.s32 40, %v1812_v10 }
 0x200   : > { %v643_v20 = vmul.f32 1.442695, %v620_v9  ;;  %v641_v27 = vmul.f32 1.442695, %v619_v18  ;;  %v1334_v48 = vpop.eup %1333  ;;  %v639_v18 = vmul.f32 1.442695, %v618_v44  ;;  %vm524_vm7 = vcmp.ne.s32.totalorder %v504_v28, %v1825_v32 }
 0x201   : > { %v662_v59 = vsel %vm518_vm6, %v1334_v48, 0.0  ;;  %vm520_vm9 = vcmp.ne.s32.totalorder %v500_v11, %v1825_v32  ;;  %v621_v44 = vsub.f32 %v1639_v29, %v576_v50  ;;  %v502_v11 = vadd.s32 %v1819_v52, %v485_v19 }
 0x202   : > { %1337 = vpow2.f32 %v643_v20  ;;  %711 = vadd.xlane.f32.xlu2 %v662_v59  ;;  %v1336_v20 = vpop.eup %1335  ;;  %v488_v19 = vadd.s32 64, %v1812_v10 }
 0x203   : > { %1339 = vpow2.f32 %v641_v27  ;;  %717 = vadd.xlane.f32.xlu1 %v665_v42  ;;  %v664_v26 = vsel %vm520_vm9, %v1336_v20, 0.0  ;;  %v492_v20 = vadd.s32 96, %v1812_v10  ;;  %vm522_vm12 = vcmp.ne.s32.totalorder %v502_v11, %v1825_v32 }
 0x204   : > { %1341 = vpow2.f32 %v639_v18  ;;  %v505_v11 = vadd.s32 %v1819_v52, %v488_v19 }
 0x205   : > { %v586_v63 = vpop.permute.xlu1 %585  ;;  %v581_v9 = vpop.permute.xlu0 %580 }
 0x206   : > { %v623_v36 = vsub.f32 %v1656_v35, %v586_v63  ;;  %v622_v23 = vsub.f32 %v1649_v33, %v581_v9  ;;  %v507_v63 = vadd.s32 %v1819_v52, %v490_v5  ;;  %v591_v9 = vpop.permute.xlu2 %590  ;;  %v493_v5 = vadd.s32 104, %v1812_v10 }
 0x207   : > { %vm525_vm15 = vcmp.ne.s32.totalorder %v505_v11, %v1825_v32  ;;  %v494_v11 = vadd.s32 112, %v1812_v10 }
 0x208   : > { %v1338_v27 = vpop.eup %1337  ;;  %v649_v17 = vmul.f32 1.442695, %v623_v36  ;;  %v647_v42 = vmul.f32 1.442695, %v622_v23  ;;  %v506_v36 = vadd.s32 %v1819_v52, %v489_v13  ;;  %v645_v23 = vmul.f32 1.442695, %v621_v44 }
 0x209   : > { %v1340_v48 = vpop.eup %1339  ;;  %v668_v59 = vsel %vm524_vm7, %v1338_v27, 0.0  ;;  %vm527_vm10 = vcmp.ne.s32.totalorder %v507_v63, %v1825_v32  ;;  %v510_v63 = vadd.s32 %v1819_v52, %v493_v5 }
 0x20a   : > { %1343 = vpow2.f32 %v649_v17  ;;  %v667_v28 = vsel %vm523_vm8, %v1340_v48, 0.0  ;;  %715 = vadd.xlane.f32.xlu2 %v664_v26  ;;  %v1342_v17 = vpop.eup %1341  ;;  %vm526_vm11 = vcmp.ne.s32.totalorder %v506_v36, %v1825_v32  ;;  %v509_v36 = vadd.s32 %v1819_v52, %v492_v20 }
 0x20b   : > { %1345 = vpow2.f32 %v647_v42  ;;  %723 = vadd.xlane.f32.xlu1 %v668_v59  ;;  %721 = vadd.xlane.f32.xlu0 %v667_v28  ;;  %v666_v26 = vsel %vm522_vm12, %v1342_v17, 0.0  ;;  %vm530_vm13 = vcmp.ne.s32.totalorder %v510_v63, %v1825_v32  ;;  %v491_v17 = vadd.s32 88, %v1812_v10 }
 0x20c   : > { %1347 = vpow2.f32 %v645_v23  ;;  %vm529_vm14 = vcmp.ne.s32.totalorder %v509_v36, %v1825_v32 }
 0x20d   : > { %v601_v33 = vpop.permute.xlu1 %600  ;;  %v596_v18 = vpop.permute.xlu0 %595 }
 0x20e   : > { %v626_v50 = vsub.f32 %v1654_v34, %v601_v33  ;;  %v625_v27 = vsub.f32 %v1641_v30, %v596_v18  ;;  %v624_v33 = vsub.f32 %v1666_v39, %v591_v9  ;;  %v495_v9 = vadd.s32 120, %v1812_v10 }
 0x210   : > { %v1344_v13 = vpop.eup %1343  ;;  %v655_v42 = vmul.f32 1.442695, %v626_v50  ;;  %v653_v48 = vmul.f32 1.442695, %v625_v27  ;;  %v651_v18 = vmul.f32 1.442695, %v624_v33  ;;  %v512_v33 = vadd.s32 %v1819_v52, %v495_v9 }
 0x211   : > { %v1346_v44 = vpop.eup %1345  ;;  %v671_v59 = vsel %vm527_vm10, %v1344_v13, 0.0  ;;  %v606_v13 = vpop.permute.xlu2 %605 }
 0x212   : > { %1349 = vpow2.f32 %v655_v42  ;;  %v670_v28 = vsel %vm526_vm11, %v1346_v44, 0.0  ;;  %719 = vadd.xlane.f32.xlu2 %v666_v26  ;;  %v1348_v27 = vpop.eup %1347  ;;  %v627_v19 = vsub.f32 %v1662_v37, %v606_v13  ;;  %vm532_vm0 = vcmp.ne.s32.totalorder %v512_v33, %v1825_v32  ;;  %v679_v13 = vld [vmem:[#allocation3 + $0x10] sm:$0xff]  ;;  %v678_v33 = vld [vmem:[#allocation3 + $0x8] sm:$0xff] }
 0x213   : > { %1351 = vpow2.f32 %v653_v48  ;;  %729 = vadd.xlane.f32.xlu1 %v671_v59  ;;  %727 = vadd.xlane.f32.xlu0 %v670_v28  ;;  %v669_v59 = vsel %vm525_vm15, %v1348_v27, 0.0  ;;  %v508_v28 = vadd.s32 %v1819_v52, %v491_v17 }
 0x214   : > { %1353 = vpow2.f32 %v651_v18  ;;  %v657_v63 = vmul.f32 1.442695, %v627_v19 }
 0x215   : > { %v611_v50 = vpop.permute.xlu0 %610  ;;  %vm528_vm1 = vcmp.ne.s32.totalorder %v508_v28, %v1825_v32 }
 0x216   : > { %v628_v23 = vsub.f32 %v1673_v41, %v611_v50 }
 0x218   : > { %v1350_v5 = vpop.eup %1349  ;;  %v659_v42 = vmul.f32 1.442695, %v628_v23  ;;  %v511_v23 = vadd.s32 %v1819_v52, %v494_v11  ;;  %v694_v52 = vmul.f32 %v1734_v43, %v678_v33  ;;  %v683_v11 = vld [vmem:[#allocation3 + $0x30] sm:$0xff] }
 0x219   : > { %v1352_v20 = vpop.eup %1351  ;;  %v674_v48 = vsel %vm530_vm13, %v1350_v5, 0.0  ;;  %v677_v5 = vld [vmem:[#allocation3] sm:$0xff] }
 0x21a   : > { %1355 = vpow2.f32 %v659_v42  ;;  %v673_v44 = vsel %vm529_vm14, %v1352_v20, 0.0  ;;  %725 = vadd.xlane.f32.xlu2 %v669_v59  ;;  %v1354_v26 = vpop.eup %1353  ;;  %vm531_vm3 = vcmp.ne.s32.totalorder %v511_v23, %v1825_v32  ;;  %v695_v42 = vmul.f32 %v1732_v25, %v679_v13 }
 0x21b   : > { %735 = vadd.xlane.f32.xlu1 %v674_v48  ;;  %733 = vadd.xlane.f32.xlu0 %v673_v44  ;;  %1357 = vpow2.f32 %v657_v63  ;;  %v672_v50 = vsel %vm528_vm1, %v1354_v26, 0.0  ;;  %v693_v17 = vmul.f32 %v1701_v62, %v677_v5  ;;  %v681_v44 = vld [vmem:[#allocation3 + $0x20] sm:$0xff]  ;;  %v699_v23 = vmul.f32 %v1774_v45, %v683_v11  ;;  %v690_v11 = vld [vmem:[#allocation3 + $0x68] sm:$0xff] }
 0x21c   : > { %v697_v32 = vmul.f32 %v1699_v60, %v681_v44 }
 0x220   : > { %v1356_v36 = vpop.eup %1355 }
 0x221   : > { %v676_v18 = vsel %vm532_vm0, %v1356_v36, 0.0  ;;  %v1358_v9 = vpop.eup %1357  ;;  %v684_v36 = vld [vmem:[#allocation3 + $0x38] sm:$0xff] }
 0x222   : > { %731 = vadd.xlane.f32.xlu2 %v672_v50  ;;  %v675_v27 = vsel %vm531_vm3, %v1358_v9, 0.0  ;;  %v700_v50 = vmul.f32 %v1785_v1, %v684_v36 }
 0x223   : > { %739 = vadd.xlane.f32.xlu0 %v676_v18  ;;  %v680_v18 = vld [vmem:[#allocation3 + $0x18] sm:$0xff] }
 0x224   : > { %v696_v9 = vmul.f32 %v1776_v51, %v680_v18  ;;  %v689_v18 = vld [vmem:[#allocation3 + $0x60] sm:$0xff] }
 0x22a   : > { %737 = vadd.xlane.f32.xlu2 %v675_v27 }
 0x26d   : > { %v714_v20 = vpop.xlane.xlu0 %713 }
 0x26e   : > { %v710_v10 = vpop.xlane.xlu1 %709  ;;  %v743_v48 = vadd.f32 %v714_v20, %v695_v42 }
 0x26f   : > { %v741_v19 = vadd.f32 %v710_v10, %v693_v17  ;;  %v687_v10 = vld [vmem:[#allocation3 + $0x50] sm:$0xff] }
 0x270   : > { %759 = vst.msk [vmem:[#allocation3 + $0x10] sm:$0xff] %vm451_vm2, %v743_v48  ;;  %v686_v48 = vld [vmem:[#allocation3 + $0x48] sm:$0xff]  ;;  %v703_v44 = vmul.f32 %v1751_v0, %v687_v10 }
 0x271   : > { %757 = vst.msk [vmem:[#allocation3] sm:$0xff] %vm451_vm2, %v741_v19  ;;  %v682_v19 = vld [vmem:[#allocation3 + $0x28] sm:$0xff]  ;;  %v702_v33 = vmul.f32 %v1755_v3, %v686_v48  ;;  %v692_v48 = vld [vmem:[#allocation3 + $0x78] sm:$0xff] }
 0x275   : > { %v712_v28 = vpop.xlane.xlu2 %711 }
 0x276   : > { %v718_v59 = vpop.xlane.xlu1 %717  ;;  %v742_v26 = vadd.f32 %v712_v28, %v694_v52 }
 0x277   : > { %v745_v63 = vadd.f32 %v718_v59, %v697_v32  ;;  %v698_v32 = vmul.f32 %v1736_v49, %v682_v19  ;;  %v688_v19 = vld [vmem:[#allocation3 + $0x58] sm:$0xff] }
 0x278   : > { %758 = vst.msk [vmem:[#allocation3 + $0x8] sm:$0xff] %vm451_vm2, %v742_v26 }
 0x279   : > { %761 = vst.msk [vmem:[#allocation3 + $0x20] sm:$0xff] %vm451_vm2, %v745_v63 }
 0x27d   : > { %v716_v17 = vpop.xlane.xlu2 %715 }
 0x27e   : > { %v724_v27 = vpop.xlane.xlu1 %723  ;;  %v722_v13 = vpop.xlane.xlu0 %721  ;;  %v744_v20 = vadd.f32 %v716_v17, %v696_v9  ;;  %v705_v9 = vmul.f32 %v1720_v15, %v689_v18 }
 0x27f   : > { %v748_v5 = vadd.f32 %v724_v27, %v700_v50  ;;  %v747_v42 = vadd.f32 %v722_v13, %v699_v23  ;;  %v685_v50 = vld [vmem:[#allocation3 + $0x40] sm:$0xff]  ;;  %v706_v23 = vmul.f32 %v1789_v4, %v690_v11 }
 0x280   : > { %760 = vst.msk [vmem:[#allocation3 + $0x18] sm:$0xff] %vm451_vm2, %v744_v20  ;;  %v701_v27 = vmul.f32 %v1716_v12, %v685_v50 }
 0x281   : > { %764 = vst.msk [vmem:[#allocation3 + $0x38] sm:$0xff] %vm451_vm2, %v748_v5 }
 0x282   : > { %763 = vst.msk [vmem:[#allocation3 + $0x30] sm:$0xff] %vm451_vm2, %v747_v42 }
 0x285   : > { %v720_v26 = vpop.xlane.xlu2 %719 }
 0x286   : > { %v730_v52 = vpop.xlane.xlu1 %729  ;;  %v728_v59 = vpop.xlane.xlu0 %727  ;;  %v746_v36 = vadd.f32 %v720_v26, %v698_v32 }
 0x287   : > { %v751_v28 = vadd.f32 %v730_v52, %v703_v44  ;;  %v750_v63 = vadd.f32 %v728_v59, %v702_v33  ;;  %v708_v44 = vmul.f32 %v1787_v2, %v692_v48  ;;  %v704_v33 = vmul.f32 %v1770_v24, %v688_v19 }
 0x288   : > { %762 = vst.msk [vmem:[#allocation3 + $0x28] sm:$0xff] %vm451_vm2, %v746_v36 }
 0x289   : > { %767 = vst.msk [vmem:[#allocation3 + $0x50] sm:$0xff] %vm451_vm2, %v751_v28 }
 0x28a   : > { %766 = vst.msk [vmem:[#allocation3 + $0x48] sm:$0xff] %vm451_vm2, %v750_v63  ;;  %v691_v63 = vld [vmem:[#allocation3 + $0x70] sm:$0xff] }
 0x28b   : > { %v707_v26 = vmul.f32 %v1783_v61, %v691_v63 }
 0x28d   : > { %v726_v20 = vpop.xlane.xlu2 %725 }
 0x28e   : > { %v736_v13 = vpop.xlane.xlu1 %735  ;;  %v734_v5 = vpop.xlane.xlu0 %733  ;;  %v749_v10 = vadd.f32 %v726_v20, %v701_v27 }
 0x28f   : > { %v754_v42 = vadd.f32 %v736_v13, %v706_v23  ;;  %v753_v17 = vadd.f32 %v734_v5, %v705_v9 }
 0x290   : > { %765 = vst.msk [vmem:[#allocation3 + $0x40] sm:$0xff] %vm451_vm2, %v749_v10 }
 0x291   : > { %770 = vst.msk [vmem:[#allocation3 + $0x68] sm:$0xff] %vm451_vm2, %v754_v42 }
 0x292   : > { %769 = vst.msk [vmem:[#allocation3 + $0x60] sm:$0xff] %vm451_vm2, %v753_v17 }
 0x295   : > { %v732_v59 = vpop.xlane.xlu2 %731 }
 0x296   : > { %v740_v32 = vpop.xlane.xlu0 %739  ;;  %v752_v28 = vadd.f32 %v732_v59, %v704_v33 }
 0x297   : > { %v756_v52 = vadd.f32 %v740_v32, %v708_v44 }
 0x298   : > { %768 = vst.msk [vmem:[#allocation3 + $0x58] sm:$0xff] %vm451_vm2, %v752_v28 }
 0x299   : > { %772 = vst.msk [vmem:[#allocation3 + $0x78] sm:$0xff] %vm451_vm2, %v756_v52 }
 0x29d   : > { %v738_v36 = vpop.xlane.xlu2 %737 }
 0x29e   : > { %v755_v11 = vadd.f32 %v738_v36, %v707_v26 }
 0x2a0   : > { %771 = vst.msk [vmem:[#allocation3 + $0x70] sm:$0xff] %vm451_vm2, %v755_v11 }
 0x2a1 PF: > { %775 = sbr.rel (!%p475_p9) target bundleno = 969 (0x3c9), region = 40  ;;  %v1469_v18 = vmov (%p475_p9), 0   ;;  %v2056_v23 = vld [vmem:[#allocation6_spill] sm:$0xff] (%p475_p9)  ;;  %v2057_v19 = vld [vmem:[#allocation9_spill] sm:$0xff] (%p475_p9) }
 0x2a2   : > { %1360 = vset.pattern.permute.xlu1 (%p475_p9), %v1469_v18  ;;  %1359 = vset.pattern.permute.xlu0 (%p475_p9), %v1469_v18 }
 0x2a3   : > { %788 = vperm.xlu1 (%p475_p9), %1360, %v1703_v6   ;;  %778 = vperm.xlu0 (%p475_p9), %1359, %v1681_v47  }
 0x2a4   : > { %1361 = vset.pattern.permute.xlu2 (%p475_p9), %v1469_v18 }
 0x2a5   : > { %798 = vperm.xlu2 (%p475_p9), %1361, %v1679_v46   ;;  %v2052_v46 = vld [vmem:[#allocation10_spill] sm:$0xff] (%p475_p9) }
 0x2ab   : > { %793 = vperm.xlu1 %1360, %v1740_v56   ;;  %783 = vperm.xlu0 %1359, %v1707_v8   ;;  %v2054_v56 = vld [vmem:[#allocation4_spill] sm:$0xff] }
 0x2ad   : > { %803 = vperm.xlu2 %1361, %v1705_v7   ;;  %v2053_v7 = vld [vmem:[#allocation7_spill] sm:$0xff] }
 0x2b3   : > { %813 = vperm.xlu1 %1360, %v1759_v16   ;;  %808 = vperm.xlu0 %1359, %v1742_v58  }
 0x2b5   : > { %818 = vperm.xlu2 %1361, %v1689_v55  }
 0x2bb   : > { %828 = vperm.xlu1 %1360, %v1722_v21   ;;  %823 = vperm.xlu0 %1359, %v1724_v22   ;;  %v2055_v22 = vld [vmem:[#allocation5_spill] sm:$0xff] }
 0x2bd   : > { %833 = vperm.xlu2 %1361, %v1738_v53  }
 0x2c3   : > { %843 = vperm.xlu1 %1360, %v1778_v54   ;;  %838 = vperm.xlu0 %1359, %v1691_v57  }
 0x2c5   : > { %848 = vperm.xlu2 %1361, %v1757_v14  }
 0x2cb   : > { %853 = vperm.xlu0 %1359, %v2052_v46  }
 0x2ff   : > { %v799_v58 = vpop.permute.xlu2 %798 }
 0x300   : > { %v860_v50 = vsub.f32 %v2055_v22, %v799_v58 }
 0x302   : > { %v880_v53 = vmul.f32 1.442695, %v860_v50 }
 0x307   : > { %v804_v42 = vpop.permute.xlu2 %803 }
 0x308   : > { %v861_v28 = vsub.f32 %v1645_v31, %v804_v42 }
 0x30a   : > { %v882_v63 = vmul.f32 1.442695, %v861_v28  ;;  %v905_v28 = vld [vmem:[#allocation3 + $0x8] sm:$0xff] }
 0x315   : > { %v789_v47 = vpop.permute.xlu1 %788  ;;  %v779_v6 = vpop.permute.xlu0 %778 }
 0x316   : > { %v858_v8 = vsub.f32 %v2053_v7, %v789_v47  ;;  %v856_v55 = vsub.f32 %v2054_v56, %v779_v6 }
 0x318   : > { %v876_v21 = vmul.f32 1.442695, %v858_v8  ;;  %v872_v16 = vmul.f32 1.442695, %v856_v55 }
 0x31a   : > { %1362 = vpow2.f32 %v876_v21 }
 0x31b   : > { %1364 = vpow2.f32 %v872_v16 }
 0x31c   : > { %1366 = vpow2.f32 %v880_v53 }
 0x31d   : > { %v794_v54 = vpop.permute.xlu1 %793  ;;  %v784_v57 = vpop.permute.xlu0 %783 }
 0x31e   : > { %v857_v14 = vsub.f32 %v2056_v23, %v784_v57  ;;  %v859_v5 = vsub.f32 %v1664_v38, %v794_v54  ;;  %v819_v38 = vpop.permute.xlu2 %818 }
 0x31f   : > { %v864_v31 = vsub.f32 %v1639_v29, %v819_v38 }
 0x320   : > { %v1363_v9 = vpop.eup %1362  ;;  %v874_v27 = vmul.f32 1.442695, %v857_v14  ;;  %v878_v17 = vmul.f32 1.442695, %v859_v5 }
 0x321   : > { %v1365_v13 = vpop.eup %1364  ;;  %940 = vadd.xlane.f32.xlu0 %v1363_v9  ;;  %v888_v56 = vmul.f32 1.442695, %v864_v31 }
 0x322   : > { %936 = vadd.xlane.f32.xlu1 %v1365_v13  ;;  %1368 = vpow2.f32 %v874_v27  ;;  %v1367_v33 = vpop.eup %1366 }
 0x323   : > { %1370 = vpow2.f32 %v878_v17 }
 0x325   : > { %v814_v20 = vpop.permute.xlu1 %813  ;;  %v809_v10 = vpop.permute.xlu0 %808 }
 0x326   : > { %v863_v48 = vsub.f32 %v1671_v40, %v814_v20  ;;  %v862_v44 = vsub.f32 %v2057_v19, %v809_v10  ;;  %v2058_v40 = vld [vmem:[#allocation8_spill] sm:$0xff]  ;;  %v834_v21 = vpop.permute.xlu2 %833  ;;  %v906_v10 = vld [vmem:[#allocation3 + $0x10] sm:$0xff] }
 0x327   : > { %v867_v29 = vsub.f32 %v1666_v39, %v834_v21  ;;  %v922_v19 = vmul.f32 %v1732_v25, %v906_v10  ;;  %v913_v21 = vld [vmem:[#allocation3 + $0x48] sm:$0xff] }
 0x328   : > { %v886_v32 = vmul.f32 1.442695, %v863_v48  ;;  %v884_v52 = vmul.f32 1.442695, %v862_v44  ;;  %v1369_v59 = vpop.eup %1368  ;;  %v904_v48 = vld [vmem:[#allocation3] sm:$0xff] }
 0x329   : > { %938 = vadd.xlane.f32.xlu2 %v1369_v59  ;;  %v1371_v46 = vpop.eup %1370  ;;  %v920_v44 = vmul.f32 %v1701_v62, %v904_v48  ;;  %v907_v62 = vld [vmem:[#allocation3 + $0x18] sm:$0xff] }
 0x32a   : > { %1372 = vpow2.f32 %v886_v32  ;;  %944 = vadd.xlane.f32.xlu1 %v1367_v33 }
 0x32b   : > { %1374 = vpow2.f32 %v884_v52 }
 0x32c   : > { %1376 = vpow2.f32 %v882_v63  ;;  %v921_v63 = vmul.f32 %v1734_v43, %v905_v28 }
 0x32d   : > { %v829_v26 = vpop.permute.xlu1 %828  ;;  %v824_v36 = vpop.permute.xlu0 %823 }
 0x32e   : > { %v866_v11 = vsub.f32 %v1656_v35, %v829_v26  ;;  %v865_v18 = vsub.f32 %v2058_v40, %v824_v36  ;;  %v911_v40 = vld [vmem:[#allocation3 + $0x38] sm:$0xff] }
 0x330   : > { %v1373_v47 = vpop.eup %1372  ;;  %v892_v6 = vmul.f32 1.442695, %v866_v11  ;;  %v890_v7 = vmul.f32 1.442695, %v865_v18  ;;  %v910_v18 = vld [vmem:[#allocation3 + $0x30] sm:$0xff] }
 0x331   : > { %v1375_v8 = vpop.eup %1374  ;;  %942 = vadd.xlane.f32.xlu2 %v1371_v46  ;;  %v927_v46 = vmul.f32 %v1785_v1, %v911_v40 }
 0x332   : > { %1378 = vpow2.f32 %v892_v6  ;;  %950 = vadd.xlane.f32.xlu1 %v1373_v47  ;;  %948 = vadd.xlane.f32.xlu0 %v1375_v8  ;;  %v1377_v22 = vpop.eup %1376  ;;  %v923_v47 = vmul.f32 %v1776_v51, %v907_v62  ;;  %v926_v6 = vmul.f32 %v1774_v45, %v910_v18  ;;  %v929_v45 = vmul.f32 %v1755_v3, %v913_v21 }
 0x333   : > { %1380 = vpow2.f32 %v890_v7 }
 0x334   : > { %1382 = vpow2.f32 %v888_v56 }
 0x335   : > { %v844_v55 = vpop.permute.xlu1 %843  ;;  %v839_v58 = vpop.permute.xlu0 %838 }
 0x336   : > { %v869_v35 = vsub.f32 %v1654_v34, %v844_v55  ;;  %v868_v16 = vsub.f32 %v1641_v30, %v839_v58  ;;  %v894_v34 = vmul.f32 1.442695, %v867_v29  ;;  %v849_v30 = vpop.permute.xlu2 %848  ;;  %v914_v55 = vld [vmem:[#allocation3 + $0x50] sm:$0xff]  ;;  %v909_v58 = vld [vmem:[#allocation3 + $0x28] sm:$0xff]  ;;  %v912_v29 = vld [vmem:[#allocation3 + $0x40] sm:$0xff] }
 0x337   : > { %v870_v42 = vsub.f32 %v1662_v37, %v849_v30  ;;  %v908_v37 = vld [vmem:[#allocation3 + $0x20] sm:$0xff]  ;;  %v930_v1 = vmul.f32 %v1751_v0, %v914_v55  ;;  %v925_v51 = vmul.f32 %v1736_v49, %v909_v58  ;;  %v928_v49 = vmul.f32 %v1716_v12, %v912_v29 }
 0x338   : > { %v1379_v50 = vpop.eup %1378  ;;  %v898_v53 = vmul.f32 1.442695, %v869_v35  ;;  %v896_v54 = vmul.f32 1.442695, %v868_v16  ;;  %v924_v38 = vmul.f32 %v1699_v60, %v908_v37 }
 0x339   : > { %v1381_v57 = vpop.eup %1380  ;;  %946 = vadd.xlane.f32.xlu2 %v1377_v22  ;;  %v900_v17 = vmul.f32 1.442695, %v870_v42  ;;  %v919_v42 = vld [vmem:[#allocation3 + $0x78] sm:$0xff] }
 0x33a   : > { %1384 = vpow2.f32 %v898_v53  ;;  %956 = vadd.xlane.f32.xlu1 %v1379_v50  ;;  %954 = vadd.xlane.f32.xlu0 %v1381_v57  ;;  %v1383_v9 = vpop.eup %1382  ;;  %v917_v57 = vld [vmem:[#allocation3 + $0x68] sm:$0xff]  ;;  %v935_v12 = vmul.f32 %v1787_v2, %v919_v42 }
 0x33b   : > { %1386 = vpow2.f32 %v896_v54  ;;  %v933_v0 = vmul.f32 %v1789_v4, %v917_v57 }
 0x33d   : > { %v854_v23 = vpop.permute.xlu0 %853 }
 0x33e   : > { %v871_v14 = vsub.f32 %v1673_v41, %v854_v23  ;;  %v916_v23 = vld [vmem:[#allocation3 + $0x60] sm:$0xff] }
 0x33f   : > { %v932_v3 = vmul.f32 %v1720_v15, %v916_v23 }
 0x340   : > { %v1385_v27 = vpop.eup %1384  ;;  %v902_v13 = vmul.f32 1.442695, %v871_v14 }
 0x341   : > { %v1387_v5 = vpop.eup %1386  ;;  %952 = vadd.xlane.f32.xlu2 %v1383_v9 }
 0x342   : > { %1388 = vpow2.f32 %v902_v13  ;;  %962 = vadd.xlane.f32.xlu1 %v1385_v27  ;;  %960 = vadd.xlane.f32.xlu0 %v1387_v5  ;;  %v915_v5 = vld [vmem:[#allocation3 + $0x58] sm:$0xff] }
 0x343   : > { %1390 = vpow2.f32 %v894_v34  ;;  %v931_v4 = vmul.f32 %v1770_v24, %v915_v5 }
 0x344   : > { %1392 = vpow2.f32 %v900_v17 }
 0x348   : > { %v1389_v39 = vpop.eup %1388 }
 0x349   : > { %v1391_v20 = vpop.eup %1390 }
 0x34a   : > { %958 = vadd.xlane.f32.xlu2 %v1391_v20  ;;  %966 = vadd.xlane.f32.xlu0 %v1389_v39  ;;  %v1393_v41 = vpop.eup %1392 }
 0x352   : > { %964 = vadd.xlane.f32.xlu2 %v1393_v41  ;;  %v918_v41 = vld [vmem:[#allocation3 + $0x70] sm:$0xff] }
 0x353   : > { %v934_v10 = vmul.f32 %v1783_v61, %v918_v41 }
 0x394   : > { %v941_v33 = vpop.xlane.xlu0 %940 }
 0x395   : > { %v937_v32 = vpop.xlane.xlu1 %936  ;;  %v970_v52 = vadd.f32 %v941_v33, %v922_v19 }
 0x396   : > { %v968_v59 = vadd.f32 %v937_v32, %v920_v44 }
 0x397   : > { %986 = vst.msk [vmem:[#allocation3 + $0x10] sm:$0xff] %vm451_vm2, %v970_v52 }
 0x398   : > { %984 = vst.msk [vmem:[#allocation3] sm:$0xff] %vm451_vm2, %v968_v59 }
 0x39c   : > { %v939_v36 = vpop.xlane.xlu2 %938 }
 0x39d   : > { %v945_v26 = vpop.xlane.xlu1 %944  ;;  %v969_v25 = vadd.f32 %v939_v36, %v921_v63 }
 0x39e   : > { %v972_v11 = vadd.f32 %v945_v26, %v924_v38 }
 0x39f   : > { %985 = vst.msk [vmem:[#allocation3 + $0x8] sm:$0xff] %vm451_vm2, %v969_v25 }
 0x3a0   : > { %988 = vst.msk [vmem:[#allocation3 + $0x20] sm:$0xff] %vm451_vm2, %v972_v11 }
 0x3a4   : > { %v943_v7 = vpop.xlane.xlu2 %942 }
 0x3a5   : > { %v951_v60 = vpop.xlane.xlu1 %950  ;;  %v971_v8 = vadd.f32 %v943_v7, %v923_v47  ;;  %v949_v31 = vpop.xlane.xlu0 %948 }
 0x3a6   : > { %v975_v43 = vadd.f32 %v951_v60, %v927_v46  ;;  %v974_v56 = vadd.f32 %v949_v31, %v926_v6 }
 0x3a7   : > { %987 = vst.msk [vmem:[#allocation3 + $0x18] sm:$0xff] %vm451_vm2, %v971_v8 }
 0x3a8   : > { %991 = vst.msk [vmem:[#allocation3 + $0x38] sm:$0xff] %vm451_vm2, %v975_v43 }
 0x3a9   : > { %990 = vst.msk [vmem:[#allocation3 + $0x30] sm:$0xff] %vm451_vm2, %v974_v56 }
 0x3ac   : > { %v947_v16 = vpop.xlane.xlu2 %946 }
 0x3ad   : > { %v957_v35 = vpop.xlane.xlu1 %956  ;;  %v973_v50 = vadd.f32 %v947_v16, %v925_v51  ;;  %v955_v53 = vpop.xlane.xlu0 %954 }
 0x3ae   : > { %v978_v22 = vadd.f32 %v957_v35, %v930_v1  ;;  %v977_v54 = vadd.f32 %v955_v53, %v929_v45 }
 0x3af   : > { %989 = vst.msk [vmem:[#allocation3 + $0x28] sm:$0xff] %vm451_vm2, %v973_v50 }
 0x3b0   : > { %994 = vst.msk [vmem:[#allocation3 + $0x50] sm:$0xff] %vm451_vm2, %v978_v22 }
 0x3b1   : > { %993 = vst.msk [vmem:[#allocation3 + $0x48] sm:$0xff] %vm451_vm2, %v977_v54 }
 0x3b4   : > { %v953_v9 = vpop.xlane.xlu2 %952 }
 0x3b5   : > { %v963_v14 = vpop.xlane.xlu1 %962  ;;  %v976_v27 = vadd.f32 %v953_v9, %v928_v49  ;;  %v961_v30 = vpop.xlane.xlu0 %960 }
 0x3b6   : > { %v981_v34 = vadd.f32 %v963_v14, %v933_v0  ;;  %v980_v13 = vadd.f32 %v961_v30, %v932_v3 }
 0x3b7   : > { %992 = vst.msk [vmem:[#allocation3 + $0x40] sm:$0xff] %vm451_vm2, %v976_v27 }
 0x3b8   : > { %997 = vst.msk [vmem:[#allocation3 + $0x68] sm:$0xff] %vm451_vm2, %v981_v34 }
 0x3b9   : > { %996 = vst.msk [vmem:[#allocation3 + $0x60] sm:$0xff] %vm451_vm2, %v980_v13 }
 0x3bd   : > { %v959_v17 = vpop.xlane.xlu2 %958  ;;  %v967_v39 = vpop.xlane.xlu0 %966 }
 0x3be   : > { %v979_v15 = vadd.f32 %v959_v17, %v931_v4  ;;  %v983_v20 = vadd.f32 %v967_v39, %v935_v12 }
 0x3c0   : > { %995 = vst.msk [vmem:[#allocation3 + $0x58] sm:$0xff] %vm451_vm2, %v979_v15 }
 0x3c1   : > { %999 = vst.msk [vmem:[#allocation3 + $0x78] sm:$0xff] %vm451_vm2, %v983_v20 }
 0x3c5   : > { %v965_v48 = vpop.xlane.xlu2 %964 }
 0x3c6   : > { %v982_v19 = vadd.f32 %v965_v48, %v934_v10 }
 0x3c8   : > { %998 = vst.msk [vmem:[#allocation3 + $0x70] sm:$0xff] %vm451_vm2, %v982_v19 }
 0x3c9 PF: > { %p1217_p10 = scmp.ne.s32.totalorder %s1448_s9, 1 }
 0x3cb   : > { %1003 = sbr.rel (%p1217_p10) target bundleno = 1006 (0x3ee), region = 44 }
 0x3d0   : > { %v1020_v24 = vld [vmem:[#allocation3] sm:$0xff]  ;;  %v1021_v44 = vld [vmem:[#allocation3 + $0x8] sm:$0xff]  ;;  %v1022_v33 = vld [vmem:[#allocation3 + $0x10] sm:$0xff] }
 0x3d1   : > { %v1036_v2 = vadd.f32 1e-12, %v1020_v24  ;;  %v1037_v32 = vadd.f32 1e-12, %v1021_v44  ;;  %v1038_v52 = vadd.f32 1e-12, %v1022_v33 }
 0x3d2   : > { %v1023_v59 = vld [vmem:[#allocation3 + $0x18] sm:$0xff]  ;;  %v1024_v28 = vld [vmem:[#allocation3 + $0x20] sm:$0xff]  ;;  %v1025_v38 = vld [vmem:[#allocation3 + $0x28] sm:$0xff] }
 0x3d3   : > { %1394 = vlog2.f32 %v1036_v2  ;;  %v1039_v37 = vadd.f32 1e-12, %v1023_v59  ;;  %v1040_v61 = vadd.f32 1e-12, %v1024_v28  ;;  %v1026_v63 = vld [vmem:[#allocation3 + $0x30] sm:$0xff]  ;;  %v1027_v11 = vld [vmem:[#allocation3 + $0x38] sm:$0xff] }
 0x3d4   : > { %1396 = vlog2.f32 %v1037_v32  ;;  %v1041_v26 = vadd.f32 1e-12, %v1025_v38  ;;  %v1042_v36 = vadd.f32 1e-12, %v1026_v63  ;;  %v1043_v25 = vadd.f32 1e-12, %v1027_v11 }
 0x3d5   : > { %1398 = vlog2.f32 %v1038_v52  ;;  %v1028_v40 = vld [vmem:[#allocation3 + $0x40] sm:$0xff]  ;;  %v1029_v18 = vld [vmem:[#allocation3 + $0x48] sm:$0xff]  ;;  %v1030_v46 = vld [vmem:[#allocation3 + $0x50] sm:$0xff] }
 0x3d6   : > { %1400 = vlog2.f32 %v1039_v37  ;;  %v1044_v62 = vadd.f32 1e-12, %v1028_v40  ;;  %v1045_v47 = vadd.f32 1e-12, %v1029_v18  ;;  %v1031_v6 = vld [vmem:[#allocation3 + $0x58] sm:$0xff]  ;;  %v1004_v7 = vld [vmem:[#allocation2] sm:$0xff] }
 0x3d7   : > { %1402 = vlog2.f32 %v1040_v61  ;;  %v1046_v43 = vadd.f32 1e-12, %v1030_v46  ;;  %v1032_v8 = vld [vmem:[#allocation3 + $0x60] sm:$0xff]  ;;  %v1005_v55 = vld [vmem:[#allocation2 + $0x8] sm:$0xff]  ;;  %v1047_v58 = vadd.f32 1e-12, %v1031_v6 }
 0x3d8   : > { %1404 = vlog2.f32 %v1041_v26  ;;  %v1033_v21 = vld [vmem:[#allocation3 + $0x68] sm:$0xff]  ;;  %v1006_v45 = vld [vmem:[#allocation2 + $0x10] sm:$0xff]  ;;  %v1048_v35 = vadd.f32 1e-12, %v1032_v8  ;;  %v1007_v54 = vld [vmem:[#allocation2 + $0x18] sm:$0xff] }
 0x3d9   : > { %v1395_v60 = vpop.eup %1394  ;;  %1406 = vlog2.f32 %v1042_v36  ;;  %v1034_v16 = vld [vmem:[#allocation3 + $0x70] sm:$0xff]  ;;  %v1049_v57 = vadd.f32 1e-12, %v1033_v21  ;;  %v1035_v29 = vld [vmem:[#allocation3 + $0x78] sm:$0xff]  ;;  %v1008_v3 = vld [vmem:[#allocation2 + $0x20] sm:$0xff] }
 0x3da   : > { %v1397_v31 = vpop.eup %1396  ;;  %v1053_v56 = vmul.f32 0.6931472, %v1395_v60  ;;  %1408 = vlog2.f32 %v1043_v25  ;;  %v1050_v14 = vadd.f32 1e-12, %v1034_v16  ;;  %v1009_v30 = vld [vmem:[#allocation2 + $0x28] sm:$0xff]  ;;  %v1010_v12 = vld [vmem:[#allocation2 + $0x30] sm:$0xff] }
 0x3db   : > { %v1399_v1 = vpop.eup %1398  ;;  %v1055_v51 = vmul.f32 0.6931472, %v1397_v31  ;;  %1410 = vlog2.f32 %v1044_v62  ;;  %v1051_v13 = vadd.f32 1e-12, %v1035_v29  ;;  %v1011_v20 = vld [vmem:[#allocation2 + $0x38] sm:$0xff]  ;;  %v1012_v19 = vld [vmem:[#allocation2 + $0x40] sm:$0xff] }
 0x3dc   : > { %v1401_v22 = vpop.eup %1400  ;;  %v1084_v50 = vadd.f32 %v1053_v56, %v1004_v7  ;;  %v1057_v53 = vmul.f32 0.6931472, %v1399_v1  ;;  %1412 = vlog2.f32 %v1045_v47  ;;  %v1013_v33 = vld [vmem:[#allocation2 + $0x48] sm:$0xff]  ;;  %v1014_v37 = vld [vmem:[#allocation2 + $0x50] sm:$0xff]  ;;  %v1015_v63 = vld [vmem:[#allocation2 + $0x58] sm:$0xff] }
 0x3dd   : > { %v1403_v23 = vpop.eup %1402  ;;  %v1085_v0 = vadd.f32 %v1055_v51, %v1005_v55  ;;  %v1059_v49 = vmul.f32 0.6931472, %v1401_v22  ;;  %1414 = vlog2.f32 %v1046_v43  ;;  %v1016_v25 = vld [vmem:[#allocation2 + $0x60] sm:$0xff]  ;;  %v1017_v46 = vld [vmem:[#allocation2 + $0x68] sm:$0xff]  ;;  %v1018_v7 = vld [vmem:[#allocation2 + $0x70] sm:$0xff] }
 0x3de   : > { %v1405_v9 = vpop.eup %1404  ;;  %1100 = vst.msk [vmem:[%s1528_s23] sm:$0xff] %vm451_vm2, %v1084_v50  ;;  %v1086_v34 = vadd.f32 %v1057_v53, %v1006_v45  ;;  %v1061_v27 = vmul.f32 0.6931472, %v1403_v23  ;;  %1416 = vlog2.f32 %v1047_v58  ;;  %v1019_v56 = vld [vmem:[#allocation2 + $0x78] sm:$0xff] }
 0x3df   : > { %v1407_v5 = vpop.eup %1406  ;;  %1101 = vst.msk [vmem:[%s1528_s23 + $0x8] sm:$0xff] %vm451_vm2, %v1085_v0  ;;  %v1087_v42 = vadd.f32 %v1059_v49, %v1007_v54  ;;  %v1063_v4 = vmul.f32 0.6931472, %v1405_v9  ;;  %1418 = vlog2.f32 %v1048_v35 }
 0x3e0   : > { %v1409_v17 = vpop.eup %1408  ;;  %1102 = vst.msk [vmem:[%s1528_s23 + $0x10] sm:$0xff] %vm451_vm2, %v1086_v34  ;;  %v1088_v15 = vadd.f32 %v1061_v27, %v1008_v3  ;;  %v1065_v39 = vmul.f32 0.6931472, %v1407_v5  ;;  %1420 = vlog2.f32 %v1049_v57 }
 0x3e1   : > { %v1411_v41 = vpop.eup %1410  ;;  %1103 = vst.msk [vmem:[%s1528_s23 + $0x18] sm:$0xff] %vm451_vm2, %v1087_v42  ;;  %v1089_v10 = vadd.f32 %v1063_v4, %v1009_v30  ;;  %v1067_v48 = vmul.f32 0.6931472, %v1409_v17  ;;  %1422 = vlog2.f32 %v1050_v14 }
 0x3e2   : > { %v1413_v24 = vpop.eup %1412  ;;  %1104 = vst.msk [vmem:[%s1528_s23 + $0x20] sm:$0xff] %vm451_vm2, %v1088_v15  ;;  %v1090_v2 = vadd.f32 %v1065_v39, %v1010_v12  ;;  %v1069_v44 = vmul.f32 0.6931472, %v1411_v41  ;;  %1424 = vlog2.f32 %v1051_v13 }
 0x3e3   : > { %v1415_v32 = vpop.eup %1414  ;;  %1105 = vst.msk [vmem:[%s1528_s23 + $0x28] sm:$0xff] %vm451_vm2, %v1089_v10  ;;  %v1091_v52 = vadd.f32 %v1067_v48, %v1011_v20  ;;  %v1071_v59 = vmul.f32 0.6931472, %v1413_v24 }
 0x3e4   : > { %v1417_v28 = vpop.eup %1416  ;;  %1106 = vst.msk [vmem:[%s1528_s23 + $0x30] sm:$0xff] %vm451_vm2, %v1090_v2  ;;  %v1092_v61 = vadd.f32 %v1069_v44, %v1012_v19  ;;  %v1073_v38 = vmul.f32 0.6931472, %v1415_v32 }
 0x3e5   : > { %v1419_v26 = vpop.eup %1418  ;;  %1107 = vst.msk [vmem:[%s1528_s23 + $0x38] sm:$0xff] %vm451_vm2, %v1091_v52  ;;  %v1093_v36 = vadd.f32 %v1071_v59, %v1013_v33  ;;  %v1075_v11 = vmul.f32 0.6931472, %v1417_v28 }
 0x3e6   : > { %v1421_v40 = vpop.eup %1420  ;;  %1108 = vst.msk [vmem:[%s1528_s23 + $0x40] sm:$0xff] %vm451_vm2, %v1092_v61  ;;  %v1094_v62 = vadd.f32 %v1073_v38, %v1014_v37  ;;  %v1077_v18 = vmul.f32 0.6931472, %v1419_v26 }
 0x3e7   : > { %v1423_v47 = vpop.eup %1422  ;;  %1109 = vst.msk [vmem:[%s1528_s23 + $0x48] sm:$0xff] %vm451_vm2, %v1093_v36  ;;  %v1095_v6 = vadd.f32 %v1075_v11, %v1015_v63  ;;  %v1079_v60 = vmul.f32 0.6931472, %v1421_v40 }
 0x3e8   : > { %v1425_v43 = vpop.eup %1424  ;;  %1110 = vst.msk [vmem:[%s1528_s23 + $0x50] sm:$0xff] %vm451_vm2, %v1094_v62  ;;  %v1096_v8 = vadd.f32 %v1077_v18, %v1016_v25  ;;  %v1081_v31 = vmul.f32 0.6931472, %v1423_v47 }
 0x3e9   : > { %1111 = vst.msk [vmem:[%s1528_s23 + $0x58] sm:$0xff] %vm451_vm2, %v1095_v6  ;;  %v1097_v55 = vadd.f32 %v1079_v60, %v1017_v46  ;;  %v1083_v58 = vmul.f32 0.6931472, %v1425_v43 }
 0x3ea   : > { %1112 = vst.msk [vmem:[%s1528_s23 + $0x60] sm:$0xff] %vm451_vm2, %v1096_v8  ;;  %v1098_v21 = vadd.f32 %v1081_v31, %v1018_v7 }
 0x3eb   : > { %1113 = vst.msk [vmem:[%s1528_s23 + $0x68] sm:$0xff] %vm451_vm2, %v1097_v55  ;;  %v1099_v1 = vadd.f32 %v1083_v58, %v1019_v56 }
 0x3ec   : > { %1114 = vst.msk [vmem:[%s1528_s23 + $0x70] sm:$0xff] %vm451_vm2, %v1098_v21 }
 0x3ed   : > { %1115 = vst.msk [vmem:[%s1528_s23 + $0x78] sm:$0xff] %vm451_vm2, %v1099_v1 }
 0x3ee PF: > { %s12_s13 = sadd.s32 1, %s1464_s13   ;;  %s2059_s9 = smov %s1456_s11 }
 0x3ef   : > { %p9_p11 = scmp.ge.s32.totalorder %s12_s13, 6   ;;  %s2060_s10 = smov %s1460_s12 }
 0x3f0   : > { %s2061_s11 = smov %s2064_s14  ;;  %s2062_s12 = smov %s2068_s15 }
 0x3f1   :  { %11 = sbr.rel (!%p9_p11) target bundleno = 3 (0x3), region = 75 }

</bundles_post_ra>
